<compile_context>
chip_gen: v7x
topology: tpu7x:2x2x1
jax: 0.10.0
libtpu: 0.0.40
codegen_flags: <defaults>
</compile_context>

<pallas_src>
import functools

import jax
import jax.numpy as jnp
from jax.experimental import pallas as pl
from jax.experimental.pallas import tpu as pltpu

BN_EPS = 1e-5


def _round_up(x, m):
    return (x + m - 1) // m * m


def _default_tile_m():
    # v5e/v6e: 128 MiB VMEM -> larger M tiles; v7x (64 MiB/TC) & default: 512.
    try:
        kind = jax.devices()[0].device_kind.lower()
        if "v5" in kind or "v6" in kind:
            return 1024
    except Exception:
        pass
    return 512


_TM = _default_tile_m()
_TK = 1024


# --------------------------------------------------------------------------
# Pass 1: tiled matmul (conv as im2col GEMM), f32 accumulator, optional ReLU.
# --------------------------------------------------------------------------
def _matmul_kernel(a_ref, w_ref, o_ref, acc_ref, *, relu):
    @pl.when(pl.program_id(1) == 0)
    def _():
        acc_ref[...] = jnp.zeros_like(acc_ref)

    acc_ref[...] += jnp.dot(a_ref[...], w_ref[...],
                            preferred_element_type=jnp.float32)

    @pl.when(pl.program_id(1) == pl.num_programs(1) - 1)
    def _():
        y = acc_ref[...]
        if relu:
            y = jnp.maximum(y, 0.0)
        o_ref[...] = y.astype(o_ref.dtype)


def _tiled_matmul(a, w, *, tm, tk, out_dtype, relu):
    m_p, k_p = a.shape
    _, n_p = w.shape
    grid = (m_p // tm, k_p // tk)
    bytes_accessed = int(a.size * a.dtype.itemsize
                         + w.size * w.dtype.itemsize
                         + m_p * n_p * jnp.dtype(out_dtype).itemsize)
    return pl.pallas_call(
        functools.partial(_matmul_kernel, relu=relu),
        out_shape=jax.ShapeDtypeStruct((m_p, n_p), out_dtype),
        grid_spec=pltpu.PrefetchScalarGridSpec(
            num_scalar_prefetch=0,
            grid=grid,
            in_specs=[
                pl.BlockSpec((tm, tk), lambda i, k: (i, k)),
                pl.BlockSpec((tk, n_p), lambda i, k: (k, 0)),
            ],
            out_specs=pl.BlockSpec((tm, n_p), lambda i, k: (i, 0)),
            scratch_shapes=[pltpu.VMEM((tm, n_p), jnp.float32)],
        ),
        compiler_params=pltpu.CompilerParams(
            dimension_semantics=("parallel", "arbitrary")),
        cost_estimate=pl.CostEstimate(
            flops=int(2 * m_p * k_p * n_p),
            transcendentals=0,
            bytes_accessed=bytes_accessed),
    )(a, w)


# --------------------------------------------------------------------------
# Pass 2 (BN layers): per-channel scale/shift (folded BN) + ReLU.
# --------------------------------------------------------------------------
def _affine_relu_kernel(y_ref, s_ref, b_ref, o_ref, *, relu):
    y = y_ref[...] * s_ref[...] + b_ref[...]
    if relu:
        y = jnp.maximum(y, 0.0)
    o_ref[...] = y.astype(o_ref.dtype)


def _affine_relu(y, scale, shift, *, tm, relu, out_dtype):
    m_p, n_p = y.shape
    bytes_accessed = int(y.size * y.dtype.itemsize
                         + m_p * n_p * jnp.dtype(out_dtype).itemsize
                         + 2 * n_p * 4)
    return pl.pallas_call(
        functools.partial(_affine_relu_kernel, relu=relu),
        out_shape=jax.ShapeDtypeStruct((m_p, n_p), out_dtype),
        grid_spec=pltpu.PrefetchScalarGridSpec(
            num_scalar_prefetch=0,
            grid=(m_p // tm,),
            in_specs=[
                pl.BlockSpec((tm, n_p), lambda i: (i, 0)),
                pl.BlockSpec((1, n_p), lambda i: (0, 0)),
                pl.BlockSpec((1, n_p), lambda i: (0, 0)),
            ],
            out_specs=pl.BlockSpec((tm, n_p), lambda i: (i, 0)),
        ),
        compiler_params=pltpu.CompilerParams(
            dimension_semantics=("parallel",)),
        cost_estimate=pl.CostEstimate(
            flops=int(2 * m_p * n_p),
            transcendentals=0,
            bytes_accessed=bytes_accessed),
    )(y, scale, shift)


# --------------------------------------------------------------------------
# im2col (XLA side): NHWC -> patch matrix [M, kH*kW*Cin], i-major, j, Cin.
# --------------------------------------------------------------------------
def _im2col(x_nhwc, k, stride, pad):
    n, h, w, c = x_nhwc.shape
    xp = jnp.pad(x_nhwc, ((0, 0), (pad, pad), (pad, pad), (0, 0)))
    ho = (h + 2 * pad - k) // stride + 1
    wo = (w + 2 * pad - k) // stride + 1
    cols = []
    for i in range(k):
        for j in range(k):
            cols.append(
                xp[:, i:i + (ho - 1) * stride + 1:stride,
                      j:j + (wo - 1) * stride + 1:stride, :])
    pat = jnp.stack(cols, axis=3)                 # [N, Ho, Wo, k*k, C]
    return pat.reshape(n * ho * wo, k * k * c), ho, wo


def conv_layer(x_nhwc, w_oihw, gamma, beta, *, stride, pad=1,
               use_bn, use_relu, final_layer):
    cout, cin, kh, kw = w_oihw.shape
    n = x_nhwc.shape[0]

    # im2col in bf16 (halves HBM traffic of the patch matrix).
    a, ho, wo = _im2col(x_nhwc.astype(jnp.bfloat16), kh, stride, pad)
    m, kdim = a.shape

    # Tile / pad sizes: lane-dense (128) outputs and reduction dim.
    cout_p = _round_up(cout, 128)
    tm = min(_TM, _round_up(m, 8))
    m_p = _round_up(m, tm)
    tk = min(_TK, _round_up(kdim, 128))
    k_p = _round_up(kdim, tk)

    a_p = jnp.pad(a, ((0, m_p - m), (0, k_p - kdim)))
    w_mat = jnp.transpose(w_oihw, (2, 3, 1, 0)).reshape(kh * kw * cin, cout)
    w_p = jnp.pad(w_mat.astype(jnp.bfloat16),
                  ((0, k_p - kdim), (0, cout_p - cout)))

    # Matmul pass.  BN layers need the raw f32 conv output for batch stats;
    # non-BN layers fuse ReLU here and emit bf16 directly (except conv5 = f32).
    mm_dtype = jnp.float32 if (use_bn or final_layer) else jnp.bfloat16
    y = _tiled_matmul(a_p, w_p, tm=tm, tk=tk, out_dtype=mm_dtype,
                      relu=(use_relu and not use_bn))

    if use_bn:
        # Training-mode BatchNorm2d: biased stats over all N*Ho*Wo rows
        # (global, not per-tile), reduced in XLA, folded to scale/shift.
        yv = y[:m, :cout]
        mean = jnp.mean(yv, axis=0)
        var = jnp.var(yv, axis=0)
        scale = gamma * jax.lax.rsqrt(var + BN_EPS)
        shift = beta - mean * scale
        scale_p = jnp.pad(scale, (0, cout_p - cout)).reshape(1, cout_p)
        shift_p = jnp.pad(shift, (0, cout_p - cout)).reshape(1, cout_p)
        out_dtype = jnp.float32 if final_layer else jnp.bfloat16
        y = _affine_relu(y, scale_p.astype(jnp.float32),
                         shift_p.astype(jnp.float32),
                         tm=tm, relu=use_relu, out_dtype=out_dtype)

    return y[:m, :cout].reshape(n, ho, wo, cout)


class Discriminator:
    """CycleGAN patch discriminator (JAX/Pallas TPU)."""

    def __init__(self, conv_dim=64, key=jax.random.PRNGKey(0)):
        d = conv_dim
        # (cin, cout, stride, batch_norm)
        specs = [
            (3, d, 2, False),          # conv1
            (d, 2 * d, 2, True),       # conv2
            (2 * d, 4 * d, 2, True),   # conv3
            (4 * d, 8 * d, 2, True),   # conv4
            (8 * d, 1, 1, False),      # conv5
        ]
        self.layers = []
        for cin, cout, stride, bn in specs:
            key, sub = jax.random.split(key)
            w = jax.random.normal(sub, (cout, cin, 4, 4), jnp.float32) * 0.05
            gamma = jnp.ones((cout,), jnp.float32)
            beta = jnp.zeros((cout,), jnp.float32)
            self.layers.append((w, gamma, beta, stride, bn))

    def __call__(self, x_nchw):
        x = jnp.transpose(x_nchw, (0, 2, 3, 1)).astype(jnp.bfloat16)  # -> NHWC
        n_layers = len(self.layers)
        for i, (w, gamma, beta, stride, bn) in enumerate(self.layers):
            last = i == n_layers - 1
            x = conv_layer(x, w, gamma, beta, stride=stride,
                           use_bn=bn, use_relu=not last, final_layer=last)
        return jnp.transpose(x, (0, 3, 1, 2)).astype(jnp.float32)     # -> NCHW


if __name__ == "__main__":
    key = jax.random.PRNGKey(0)
    k_x, k_p = jax.random.split(key)
    # batch=2, 3 input channels, 32x32 spatial (so conv5's 4x4 kernel fits),
    # conv_dim=8 -> output shape (2, 1, 1, 1).
    x = jax.random.normal(k_x, (2, 3, 32, 32), jnp.float32)
    model = Discriminator(conv_dim=8, key=k_p)
    out = jax.jit(model.__call__)(x)
    out = jax.block_until_ready(out)
    assert out.shape == (2, 1, 1, 1), out.shape
    assert bool(jnp.all(jnp.isfinite(out)))
    print("KERNEL_OK")
</pallas_src>

<mosaic_0001>
module attributes {stable_mosaic.version = 11 : i64} {
  func.func @_matmul_kernel(%arg0: i32, %arg1: i32, %arg2: memref<512x128xbf16, #tpu.memory_space<vmem>>, %arg3: memref<128x128xbf16, #tpu.memory_space<vmem>>, %arg4: memref<512x128xbf16, #tpu.memory_space<vmem>>, %arg5: memref<512x128xf32, #tpu.memory_space<vmem>>) attributes {dimension_semantics = [#tpu.dimension_semantics<parallel>, #tpu.dimension_semantics<arbitrary>], iteration_bounds = array<i64: 1, 1>, scalar_prefetch = 0 : i64, scratch_operands = 1 : i64, tpu.core_type = #tpu.core_type<tc>, window_params = [{transform_indices = @transform_0, window_bounds = array<i64: 512, 128>}, {transform_indices = @transform_1, window_bounds = array<i64: 128, 128>}, {transform_indices = @transform_2, window_bounds = array<i64: 512, 128>}]} {
    %c0_i32 = arith.constant 0 : i32
    %0 = arith.cmpi eq, %arg1, %c0_i32 : i32
    %1 = arith.extui %0 : i1 to i32
    %c0_i32_0 = arith.constant 0 : i32
    %2 = arith.cmpi ne, %1, %c0_i32_0 : i32
    scf.if %2 {
      %cst_10 = arith.constant 0.000000e+00 : f32
      %12 = vector.broadcast %cst_10 : f32 to vector<512x128xf32>
      %c0_11 = arith.constant 0 : index
      %c0_12 = arith.constant 0 : index
      %13 = vector.load %arg5[%c0_11, %c0_12] : memref<512x128xf32, #tpu.memory_space<vmem>>, vector<512x128xf32>
      tpu.vector_store %arg5[%c0_11, %c0_12], %12 {strides = array<i32>} : memref<512x128xf32, #tpu.memory_space<vmem>>, vector<512x128xf32>,
    } else {
    }
    %c0 = arith.constant 0 : index
    %c0_1 = arith.constant 0 : index
    %3 = vector.load %arg5[%c0, %c0_1] : memref<512x128xf32, #tpu.memory_space<vmem>>, vector<512x128xf32>
    %c0_2 = arith.constant 0 : index
    %c0_3 = arith.constant 0 : index
    %4 = vector.load %arg2[%c0_2, %c0_3] : memref<512x128xbf16, #tpu.memory_space<vmem>>, vector<512x128xbf16>
    %c0_4 = arith.constant 0 : index
    %c0_5 = arith.constant 0 : index
    %5 = vector.load %arg3[%c0_4, %c0_5] : memref<128x128xbf16, #tpu.memory_space<vmem>>, vector<128x128xbf16>
    %cst = arith.constant dense<0.000000e+00> : vector<512x128xf32>
    %6 = tpu.matmul %4, %5, %cst {dimension_numbers = #tpu.dot_dimension_numbers<[1], [0], [0], [1], [0, 0, 1, 1], [], []>} : vector<512x128xbf16>, vector<128x128xbf16>, vector<512x128xf32> -> vector<512x128xf32>
    %7 = arith.addf %3, %6 : vector<512x128xf32>
    %c0_6 = arith.constant 0 : index
    %c0_7 = arith.constant 0 : index
    %8 = vector.load %arg5[%c0_6, %c0_7] : memref<512x128xf32, #tpu.memory_space<vmem>>, vector<512x128xf32>
    tpu.vector_store %arg5[%c0_6, %c0_7], %7 {strides = array<i32>} : memref<512x128xf32, #tpu.memory_space<vmem>>, vector<512x128xf32>,
    %c0_i32_8 = arith.constant 0 : i32
    %9 = arith.cmpi eq, %arg1, %c0_i32_8 : i32
    %10 = arith.extui %9 : i1 to i32
    %c0_i32_9 = arith.constant 0 : i32
    %11 = arith.cmpi ne, %10, %c0_i32_9 : i32
    scf.if %11 {
      %c0_10 = arith.constant 0 : index
      %c0_11 = arith.constant 0 : index
      %12 = vector.load %arg5[%c0_10, %c0_11] : memref<512x128xf32, #tpu.memory_space<vmem>>, vector<512x128xf32>
      %cst_12 = arith.constant 0.000000e+00 : f32
      %13 = vector.broadcast %cst_12 : f32 to vector<512x128xf32>
      %14 = arith.maximumf %12, %13 : vector<512x128xf32>
      %15 = arith.truncf %14 : vector<512x128xf32> to vector<512x128xbf16>
      %c0_13 = arith.constant 0 : index
      %c0_14 = arith.constant 0 : index
      %16 = vector.load %arg4[%c0_13, %c0_14] : memref<512x128xbf16, #tpu.memory_space<vmem>>, vector<512x128xbf16>
      tpu.vector_store %arg4[%c0_13, %c0_14], %15 {strides = array<i32>} : memref<512x128xbf16, #tpu.memory_space<vmem>>, vector<512x128xbf16>,
    } else {
    }
    return
  }
  func.func @transform_0(%arg0: i32, %arg1: i32) -> (i32, i32) {
    %c0_i32 = arith.constant 0 : i32
    return %arg0, %arg1 : i32, i32
  }
  func.func @transform_1(%arg0: i32, %arg1: i32) -> (i32, i32) {
    %c0_i32 = arith.constant 0 : i32
    %c0_i32_0 = arith.constant 0 : i32
    return %arg1, %c0_i32 : i32, i32
  }
  func.func @transform_2(%arg0: i32, %arg1: i32) -> (i32, i32) {
    %c0_i32 = arith.constant 0 : i32
    %c0_i32_0 = arith.constant 0 : i32
    return %arg0, %c0_i32 : i32, i32
  }
}

module attributes {stable_mosaic.version = 11 : i64} {
  func.func @_matmul_kernel(%arg0: i32, %arg1: i32, %arg2: memref<128x128xbf16, #tpu.memory_space<vmem>>, %arg3: memref<128x128xbf16, #tpu.memory_space<vmem>>, %arg4: memref<128x128xf32, #tpu.memory_space<vmem>>, %arg5: memref<128x128xf32, #tpu.memory_space<vmem>>) attributes {dimension_semantics = [#tpu.dimension_semantics<parallel>, #tpu.dimension_semantics<arbitrary>], iteration_bounds = array<i64: 1, 1>, scalar_prefetch = 0 : i64, scratch_operands = 1 : i64, tpu.core_type = #tpu.core_type<tc>, window_params = [{transform_indices = @transform_0, window_bounds = array<i64: 128, 128>}, {transform_indices = @transform_1, window_bounds = array<i64: 128, 128>}, {transform_indices = @transform_2, window_bounds = array<i64: 128, 128>}]} {
    %c0_i32 = arith.constant 0 : i32
    %0 = arith.cmpi eq, %arg1, %c0_i32 : i32
    %1 = arith.extui %0 : i1 to i32
    %c0_i32_0 = arith.constant 0 : i32
    %2 = arith.cmpi ne, %1, %c0_i32_0 : i32
    scf.if %2 {
      %cst_10 = arith.constant 0.000000e+00 : f32
      %12 = vector.broadcast %cst_10 : f32 to vector<128x128xf32>
      %c0_11 = arith.constant 0 : index
      %c0_12 = arith.constant 0 : index
      %13 = vector.load %arg5[%c0_11, %c0_12] : memref<128x128xf32, #tpu.memory_space<vmem>>, vector<128x128xf32>
      tpu.vector_store %arg5[%c0_11, %c0_12], %12 {strides = array<i32>} : memref<128x128xf32, #tpu.memory_space<vmem>>, vector<128x128xf32>,
    } else {
    }
    %c0 = arith.constant 0 : index
    %c0_1 = arith.constant 0 : index
    %3 = vector.load %arg5[%c0, %c0_1] : memref<128x128xf32, #tpu.memory_space<vmem>>, vector<128x128xf32>
    %c0_2 = arith.constant 0 : index
    %c0_3 = arith.constant 0 : index
    %4 = vector.load %arg2[%c0_2, %c0_3] : memref<128x128xbf16, #tpu.memory_space<vmem>>, vector<128x128xbf16>
    %c0_4 = arith.constant 0 : index
    %c0_5 = arith.constant 0 : index
    %5 = vector.load %arg3[%c0_4, %c0_5] : memref<128x128xbf16, #tpu.memory_space<vmem>>, vector<128x128xbf16>
    %cst = arith.constant dense<0.000000e+00> : vector<128x128xf32>
    %6 = tpu.matmul %4, %5, %cst {dimension_numbers = #tpu.dot_dimension_numbers<[1], [0], [0], [1], [0, 0, 1, 1], [], []>} : vector<128x128xbf16>, vector<128x128xbf16>, vector<128x128xf32> -> vector<128x128xf32>
    %7 = arith.addf %3, %6 : vector<128x128xf32>
    %c0_6 = arith.constant 0 : index
    %c0_7 = arith.constant 0 : index
    %8 = vector.load %arg5[%c0_6, %c0_7] : memref<128x128xf32, #tpu.memory_space<vmem>>, vector<128x128xf32>
    tpu.vector_store %arg5[%c0_6, %c0_7], %7 {strides = array<i32>} : memref<128x128xf32, #tpu.memory_space<vmem>>, vector<128x128xf32>,
    %c0_i32_8 = arith.constant 0 : i32
    %9 = arith.cmpi eq, %arg1, %c0_i32_8 : i32
    %10 = arith.extui %9 : i1 to i32
    %c0_i32_9 = arith.constant 0 : i32
    %11 = arith.cmpi ne, %10, %c0_i32_9 : i32
    scf.if %11 {
      %c0_10 = arith.constant 0 : index
      %c0_11 = arith.constant 0 : index
      %12 = vector.load %arg5[%c0_10, %c0_11] : memref<128x128xf32, #tpu.memory_space<vmem>>, vector<128x128xf32>
      %c0_12 = arith.constant 0 : index
      %c0_13 = arith.constant 0 : index
      %13 = vector.load %arg4[%c0_12, %c0_13] : memref<128x128xf32, #tpu.memory_space<vmem>>, vector<128x128xf32>
      tpu.vector_store %arg4[%c0_12, %c0_13], %12 {strides = array<i32>} : memref<128x128xf32, #tpu.memory_space<vmem>>, vector<128x128xf32>,
    } else {
    }
    return
  }
  func.func @transform_0(%arg0: i32, %arg1: i32) -> (i32, i32) {
    %c0_i32 = arith.constant 0 : i32
    return %arg0, %arg1 : i32, i32
  }
  func.func @transform_1(%arg0: i32, %arg1: i32) -> (i32, i32) {
    %c0_i32 = arith.constant 0 : i32
    %c0_i32_0 = arith.constant 0 : i32
    return %arg1, %c0_i32 : i32, i32
  }
  func.func @transform_2(%arg0: i32, %arg1: i32) -> (i32, i32) {
    %c0_i32 = arith.constant 0 : i32
    %c0_i32_0 = arith.constant 0 : i32
    return %arg0, %c0_i32 : i32, i32
  }
}

module attributes {stable_mosaic.version = 11 : i64} {
  func.func @_affine_relu_kernel(%arg0: i32, %arg1: memref<128x128xf32, #tpu.memory_space<vmem>>, %arg2: memref<1x128xf32, #tpu.memory_space<vmem>>, %arg3: memref<1x128xf32, #tpu.memory_space<vmem>>, %arg4: memref<128x128xbf16, #tpu.memory_space<vmem>>) attributes {dimension_semantics = [#tpu.dimension_semantics<parallel>], iteration_bounds = array<i64: 1>, scalar_prefetch = 0 : i64, scratch_operands = 0 : i64, tpu.core_type = #tpu.core_type<tc>, window_params = [{transform_indices = @transform_0, window_bounds = array<i64: 128, 128>}, {pipeline_mode = #tpu.pipeline_mode<synchronous>, transform_indices = @transform_1, window_bounds = array<i64: 1, 128>}, {pipeline_mode = #tpu.pipeline_mode<synchronous>, transform_indices = @transform_2, window_bounds = array<i64: 1, 128>}, {transform_indices = @transform_3, window_bounds = array<i64: 128, 128>}]} {
    %c0 = arith.constant 0 : index
    %c0_0 = arith.constant 0 : index
    %0 = vector.load %arg1[%c0, %c0_0] : memref<128x128xf32, #tpu.memory_space<vmem>>, vector<128x128xf32>
    %c0_1 = arith.constant 0 : index
    %c0_2 = arith.constant 0 : index
    %1 = vector.load %arg2[%c0_1, %c0_2] : memref<1x128xf32, #tpu.memory_space<vmem>>, vector<1x128xf32>
    %2 = vector.broadcast %1 : vector<1x128xf32> to vector<128x128xf32>
    %3 = arith.mulf %0, %2 : vector<128x128xf32>
    %c0_3 = arith.constant 0 : index
    %c0_4 = arith.constant 0 : index
    %4 = vector.load %arg3[%c0_3, %c0_4] : memref<1x128xf32, #tpu.memory_space<vmem>>, vector<1x128xf32>
    %5 = vector.broadcast %4 : vector<1x128xf32> to vector<128x128xf32>
    %6 = arith.addf %3, %5 : vector<128x128xf32>
    %cst = arith.constant 0.000000e+00 : f32
    %7 = vector.broadcast %cst : f32 to vector<128x128xf32>
    %8 = arith.maximumf %6, %7 : vector<128x128xf32>
    %9 = arith.truncf %8 : vector<128x128xf32> to vector<128x128xbf16>
    %c0_5 = arith.constant 0 : index
    %c0_6 = arith.constant 0 : index
    %10 = vector.load %arg4[%c0_5, %c0_6] : memref<128x128xbf16, #tpu.memory_space<vmem>>, vector<128x128xbf16>
    tpu.vector_store %arg4[%c0_5, %c0_6], %9 {strides = array<i32>} : memref<128x128xbf16, #tpu.memory_space<vmem>>, vector<128x128xbf16>,
    return
  }
  func.func @transform_0(%arg0: i32) -> (i32, i32) {
    %c0_i32 = arith.constant 0 : i32
    %c0_i32_0 = arith.constant 0 : i32
    return %arg0, %c0_i32 : i32, i32
  }
  func.func @transform_1(%arg0: i32) -> (i32, i32) {
    %c0_i32 = arith.constant 0 : i32
    %c0_i32_0 = arith.constant 0 : i32
    %c0_i32_1 = arith.constant 0 : i32
    return %c0_i32, %c0_i32_0 : i32, i32
  }
  func.func @transform_2(%arg0: i32) -> (i32, i32) {
    %c0_i32 = arith.constant 0 : i32
    %c0_i32_0 = arith.constant 0 : i32
    %c0_i32_1 = arith.constant 0 : i32
    return %c0_i32, %c0_i32_0 : i32, i32
  }
  func.func @transform_3(%arg0: i32) -> (i32, i32) {
    %c0_i32 = arith.constant 0 : i32
    %c0_i32_0 = arith.constant 0 : i32
    return %arg0, %c0_i32 : i32, i32
  }
}

module attributes {stable_mosaic.version = 11 : i64} {
  func.func @_matmul_kernel(%arg0: i32, %arg1: i32, %arg2: memref<32x256xbf16, #tpu.memory_space<vmem>>, %arg3: memref<256x128xbf16, #tpu.memory_space<vmem>>, %arg4: memref<32x128xf32, #tpu.memory_space<vmem>>, %arg5: memref<32x128xf32, #tpu.memory_space<vmem>>) attributes {dimension_semantics = [#tpu.dimension_semantics<parallel>, #tpu.dimension_semantics<arbitrary>], iteration_bounds = array<i64: 1, 1>, scalar_prefetch = 0 : i64, scratch_operands = 1 : i64, tpu.core_type = #tpu.core_type<tc>, window_params = [{transform_indices = @transform_0, window_bounds = array<i64: 32, 256>}, {transform_indices = @transform_1, window_bounds = array<i64: 256, 128>}, {transform_indices = @transform_2, window_bounds = array<i64: 32, 128>}]} {
    %c0_i32 = arith.constant 0 : i32
    %0 = arith.cmpi eq, %arg1, %c0_i32 : i32
    %1 = arith.extui %0 : i1 to i32
    %c0_i32_0 = arith.constant 0 : i32
    %2 = arith.cmpi ne, %1, %c0_i32_0 : i32
    scf.if %2 {
      %cst_10 = arith.constant 0.000000e+00 : f32
      %12 = vector.broadcast %cst_10 : f32 to vector<32x128xf32>
      %c0_11 = arith.constant 0 : index
      %c0_12 = arith.constant 0 : index
      %13 = vector.load %arg5[%c0_11, %c0_12] : memref<32x128xf32, #tpu.memory_space<vmem>>, vector<32x128xf32>
      tpu.vector_store %arg5[%c0_11, %c0_12], %12 {strides = array<i32>} : memref<32x128xf32, #tpu.memory_space<vmem>>, vector<32x128xf32>,
    } else {
    }
    %c0 = arith.constant 0 : index
    %c0_1 = arith.constant 0 : index
    %3 = vector.load %arg5[%c0, %c0_1] : memref<32x128xf32, #tpu.memory_space<vmem>>, vector<32x128xf32>
    %c0_2 = arith.constant 0 : index
    %c0_3 = arith.constant 0 : index
    %4 = vector.load %arg2[%c0_2, %c0_3] : memref<32x256xbf16, #tpu.memory_space<vmem>>, vector<32x256xbf16>
    %c0_4 = arith.constant 0 : index
    %c0_5 = arith.constant 0 : index
    %5 = vector.load %arg3[%c0_4, %c0_5] : memref<256x128xbf16, #tpu.memory_space<vmem>>, vector<256x128xbf16>
    %cst = arith.constant dense<0.000000e+00> : vector<32x128xf32>
    %6 = tpu.matmul %4, %5, %cst {dimension_numbers = #tpu.dot_dimension_numbers<[1], [0], [0], [1], [0, 0, 1, 1], [], []>} : vector<32x256xbf16>, vector<256x128xbf16>, vector<32x128xf32> -> vector<32x128xf32>
    %7 = arith.addf %3, %6 : vector<32x128xf32>
    %c0_6 = arith.constant 0 : index
    %c0_7 = arith.constant 0 : index
    %8 = vector.load %arg5[%c0_6, %c0_7] : memref<32x128xf32, #tpu.memory_space<vmem>>, vector<32x128xf32>
    tpu.vector_store %arg5[%c0_6, %c0_7], %7 {strides = array<i32>} : memref<32x128xf32, #tpu.memory_space<vmem>>, vector<32x128xf32>,
    %c0_i32_8 = arith.constant 0 : i32
    %9 = arith.cmpi eq, %arg1, %c0_i32_8 : i32
    %10 = arith.extui %9 : i1 to i32
    %c0_i32_9 = arith.constant 0 : i32
    %11 = arith.cmpi ne, %10, %c0_i32_9 : i32
    scf.if %11 {
      %c0_10 = arith.constant 0 : index
      %c0_11 = arith.constant 0 : index
      %12 = vector.load %arg5[%c0_10, %c0_11] : memref<32x128xf32, #tpu.memory_space<vmem>>, vector<32x128xf32>
      %c0_12 = arith.constant 0 : index
      %c0_13 = arith.constant 0 : index
      %13 = vector.load %arg4[%c0_12, %c0_13] : memref<32x128xf32, #tpu.memory_space<vmem>>, vector<32x128xf32>
      tpu.vector_store %arg4[%c0_12, %c0_13], %12 {strides = array<i32>} : memref<32x128xf32, #tpu.memory_space<vmem>>, vector<32x128xf32>,
    } else {
    }
    return
  }
  func.func @transform_0(%arg0: i32, %arg1: i32) -> (i32, i32) {
    %c0_i32 = arith.constant 0 : i32
    return %arg0, %arg1 : i32, i32
  }
  func.func @transform_1(%arg0: i32, %arg1: i32) -> (i32, i32) {
    %c0_i32 = arith.constant 0 : i32
    %c0_i32_0 = arith.constant 0 : i32
    return %arg1, %c0_i32 : i32, i32
  }
  func.func @transform_2(%arg0: i32, %arg1: i32) -> (i32, i32) {
    %c0_i32 = arith.constant 0 : i32
    %c0_i32_0 = arith.constant 0 : i32
    return %arg0, %c0_i32 : i32, i32
  }
}

module attributes {stable_mosaic.version = 11 : i64} {
  func.func @_affine_relu_kernel(%arg0: i32, %arg1: memref<32x128xf32, #tpu.memory_space<vmem>>, %arg2: memref<1x128xf32, #tpu.memory_space<vmem>>, %arg3: memref<1x128xf32, #tpu.memory_space<vmem>>, %arg4: memref<32x128xbf16, #tpu.memory_space<vmem>>) attributes {dimension_semantics = [#tpu.dimension_semantics<parallel>], iteration_bounds = array<i64: 1>, scalar_prefetch = 0 : i64, scratch_operands = 0 : i64, tpu.core_type = #tpu.core_type<tc>, window_params = [{transform_indices = @transform_0, window_bounds = array<i64: 32, 128>}, {pipeline_mode = #tpu.pipeline_mode<synchronous>, transform_indices = @transform_1, window_bounds = array<i64: 1, 128>}, {pipeline_mode = #tpu.pipeline_mode<synchronous>, transform_indices = @transform_2, window_bounds = array<i64: 1, 128>}, {transform_indices = @transform_3, window_bounds = array<i64: 32, 128>}]} {
    %c0 = arith.constant 0 : index
    %c0_0 = arith.constant 0 : index
    %0 = vector.load %arg1[%c0, %c0_0] : memref<32x128xf32, #tpu.memory_space<vmem>>, vector<32x128xf32>
    %c0_1 = arith.constant 0 : index
    %c0_2 = arith.constant 0 : index
    %1 = vector.load %arg2[%c0_1, %c0_2] : memref<1x128xf32, #tpu.memory_space<vmem>>, vector<1x128xf32>
    %2 = vector.broadcast %1 : vector<1x128xf32> to vector<32x128xf32>
    %3 = arith.mulf %0, %2 : vector<32x128xf32>
    %c0_3 = arith.constant 0 : index
    %c0_4 = arith.constant 0 : index
    %4 = vector.load %arg3[%c0_3, %c0_4] : memref<1x128xf32, #tpu.memory_space<vmem>>, vector<1x128xf32>
    %5 = vector.broadcast %4 : vector<1x128xf32> to vector<32x128xf32>
    %6 = arith.addf %3, %5 : vector<32x128xf32>
    %cst = arith.constant 0.000000e+00 : f32
    %7 = vector.broadcast %cst : f32 to vector<32x128xf32>
    %8 = arith.maximumf %6, %7 : vector<32x128xf32>
    %9 = arith.truncf %8 : vector<32x128xf32> to vector<32x128xbf16>
    %c0_5 = arith.constant 0 : index
    %c0_6 = arith.constant 0 : index
    %10 = vector.load %arg4[%c0_5, %c0_6] : memref<32x128xbf16, #tpu.memory_space<vmem>>, vector<32x128xbf16>
    tpu.vector_store %arg4[%c0_5, %c0_6], %9 {strides = array<i32>} : memref<32x128xbf16, #tpu.memory_space<vmem>>, vector<32x128xbf16>,
    return
  }
  func.func @transform_0(%arg0: i32) -> (i32, i32) {
    %c0_i32 = arith.constant 0 : i32
    %c0_i32_0 = arith.constant 0 : i32
    return %arg0, %c0_i32 : i32, i32
  }
  func.func @transform_1(%arg0: i32) -> (i32, i32) {
    %c0_i32 = arith.constant 0 : i32
    %c0_i32_0 = arith.constant 0 : i32
    %c0_i32_1 = arith.constant 0 : i32
    return %c0_i32, %c0_i32_0 : i32, i32
  }
  func.func @transform_2(%arg0: i32) -> (i32, i32) {
    %c0_i32 = arith.constant 0 : i32
    %c0_i32_0 = arith.constant 0 : i32
    %c0_i32_1 = arith.constant 0 : i32
    return %c0_i32, %c0_i32_0 : i32, i32
  }
  func.func @transform_3(%arg0: i32) -> (i32, i32) {
    %c0_i32 = arith.constant 0 : i32
    %c0_i32_0 = arith.constant 0 : i32
    return %arg0, %c0_i32 : i32, i32
  }
}

module attributes {stable_mosaic.version = 11 : i64} {
  func.func @_affine_relu_kernel(%arg0: i32, %arg1: memref<8x128xf32, #tpu.memory_space<vmem>>, %arg2: memref<1x128xf32, #tpu.memory_space<vmem>>, %arg3: memref<1x128xf32, #tpu.memory_space<vmem>>, %arg4: memref<8x128xbf16, #tpu.memory_space<vmem>>) attributes {dimension_semantics = [#tpu.dimension_semantics<parallel>], iteration_bounds = array<i64: 1>, scalar_prefetch = 0 : i64, scratch_operands = 0 : i64, tpu.core_type = #tpu.core_type<tc>, window_params = [{transform_indices = @transform_0, window_bounds = array<i64: 8, 128>}, {pipeline_mode = #tpu.pipeline_mode<synchronous>, transform_indices = @transform_1, window_bounds = array<i64: 1, 128>}, {pipeline_mode = #tpu.pipeline_mode<synchronous>, transform_indices = @transform_2, window_bounds = array<i64: 1, 128>}, {transform_indices = @transform_3, window_bounds = array<i64: 8, 128>}]} {
    %c0 = arith.constant 0 : index
    %c0_0 = arith.constant 0 : index
    %0 = vector.load %arg1[%c0, %c0_0] : memref<8x128xf32, #tpu.memory_space<vmem>>, vector<8x128xf32>
    %c0_1 = arith.constant 0 : index
    %c0_2 = arith.constant 0 : index
    %1 = vector.load %arg2[%c0_1, %c0_2] : memref<1x128xf32, #tpu.memory_space<vmem>>, vector<1x128xf32>
    %2 = vector.broadcast %1 : vector<1x128xf32> to vector<8x128xf32>
    %3 = arith.mulf %0, %2 : vector<8x128xf32>
    %c0_3 = arith.constant 0 : index
    %c0_4 = arith.constant 0 : index
    %4 = vector.load %arg3[%c0_3, %c0_4] : memref<1x128xf32, #tpu.memory_space<vmem>>, vector<1x128xf32>
    %5 = vector.broadcast %4 : vector<1x128xf32> to vector<8x128xf32>
    %6 = arith.addf %3, %5 : vector<8x128xf32>
    %cst = arith.constant 0.000000e+00 : f32
    %7 = vector.broadcast %cst : f32 to vector<8x128xf32>
    %8 = arith.maximumf %6, %7 : vector<8x128xf32>
    %9 = arith.truncf %8 : vector<8x128xf32> to vector<8x128xbf16>
    %c0_5 = arith.constant 0 : index
    %c0_6 = arith.constant 0 : index
    %10 = vector.load %arg4[%c0_5, %c0_6] : memref<8x128xbf16, #tpu.memory_space<vmem>>, vector<8x128xbf16>
    tpu.vector_store %arg4[%c0_5, %c0_6], %9 {strides = array<i32>} : memref<8x128xbf16, #tpu.memory_space<vmem>>, vector<8x128xbf16>,
    return
  }
  func.func @transform_0(%arg0: i32) -> (i32, i32) {
    %c0_i32 = arith.constant 0 : i32
    %c0_i32_0 = arith.constant 0 : i32
    return %arg0, %c0_i32 : i32, i32
  }
  func.func @transform_1(%arg0: i32) -> (i32, i32) {
    %c0_i32 = arith.constant 0 : i32
    %c0_i32_0 = arith.constant 0 : i32
    %c0_i32_1 = arith.constant 0 : i32
    return %c0_i32, %c0_i32_0 : i32, i32
  }
  func.func @transform_2(%arg0: i32) -> (i32, i32) {
    %c0_i32 = arith.constant 0 : i32
    %c0_i32_0 = arith.constant 0 : i32
    %c0_i32_1 = arith.constant 0 : i32
    return %c0_i32, %c0_i32_0 : i32, i32
  }
  func.func @transform_3(%arg0: i32) -> (i32, i32) {
    %c0_i32 = arith.constant 0 : i32
    %c0_i32_0 = arith.constant 0 : i32
    return %arg0, %c0_i32 : i32, i32
  }
}

module attributes {stable_mosaic.version = 11 : i64} {
  func.func @_matmul_kernel(%arg0: i32, %arg1: i32, %arg2: memref<8x512xbf16, #tpu.memory_space<vmem>>, %arg3: memref<512x128xbf16, #tpu.memory_space<vmem>>, %arg4: memref<8x128xf32, #tpu.memory_space<vmem>>, %arg5: memref<8x128xf32, #tpu.memory_space<vmem>>) attributes {dimension_semantics = [#tpu.dimension_semantics<parallel>, #tpu.dimension_semantics<arbitrary>], iteration_bounds = array<i64: 1, 1>, scalar_prefetch = 0 : i64, scratch_operands = 1 : i64, tpu.core_type = #tpu.core_type<tc>, window_params = [{transform_indices = @transform_0, window_bounds = array<i64: 8, 512>}, {transform_indices = @transform_1, window_bounds = array<i64: 512, 128>}, {transform_indices = @transform_2, window_bounds = array<i64: 8, 128>}]} {
    %c0_i32 = arith.constant 0 : i32
    %0 = arith.cmpi eq, %arg1, %c0_i32 : i32
    %1 = arith.extui %0 : i1 to i32
    %c0_i32_0 = arith.constant 0 : i32
    %2 = arith.cmpi ne, %1, %c0_i32_0 : i32
    scf.if %2 {
      %cst_10 = arith.constant 0.000000e+00 : f32
      %12 = vector.broadcast %cst_10 : f32 to vector<8x128xf32>
      %c0_11 = arith.constant 0 : index
      %c0_12 = arith.constant 0 : index
      %13 = vector.load %arg5[%c0_11, %c0_12] : memref<8x128xf32, #tpu.memory_space<vmem>>, vector<8x128xf32>
      tpu.vector_store %arg5[%c0_11, %c0_12], %12 {strides = array<i32>} : memref<8x128xf32, #tpu.memory_space<vmem>>, vector<8x128xf32>,
    } else {
    }
    %c0 = arith.constant 0 : index
    %c0_1 = arith.constant 0 : index
    %3 = vector.load %arg5[%c0, %c0_1] : memref<8x128xf32, #tpu.memory_space<vmem>>, vector<8x128xf32>
    %c0_2 = arith.constant 0 : index
    %c0_3 = arith.constant 0 : index
    %4 = vector.load %arg2[%c0_2, %c0_3] : memref<8x512xbf16, #tpu.memory_space<vmem>>, vector<8x512xbf16>
    %c0_4 = arith.constant 0 : index
    %c0_5 = arith.constant 0 : index
    %5 = vector.load %arg3[%c0_4, %c0_5] : memref<512x128xbf16, #tpu.memory_space<vmem>>, vector<512x128xbf16>
    %cst = arith.constant dense<0.000000e+00> : vector<8x128xf32>
    %6 = tpu.matmul %4, %5, %cst {dimension_numbers = #tpu.dot_dimension_numbers<[1], [0], [0], [1], [0, 0, 1, 1], [], []>} : vector<8x512xbf16>, vector<512x128xbf16>, vector<8x128xf32> -> vector<8x128xf32>
    %7 = arith.addf %3, %6 : vector<8x128xf32>
    %c0_6 = arith.constant 0 : index
    %c0_7 = arith.constant 0 : index
    %8 = vector.load %arg5[%c0_6, %c0_7] : memref<8x128xf32, #tpu.memory_space<vmem>>, vector<8x128xf32>
    tpu.vector_store %arg5[%c0_6, %c0_7], %7 {strides = array<i32>} : memref<8x128xf32, #tpu.memory_space<vmem>>, vector<8x128xf32>,
    %c0_i32_8 = arith.constant 0 : i32
    %9 = arith.cmpi eq, %arg1, %c0_i32_8 : i32
    %10 = arith.extui %9 : i1 to i32
    %c0_i32_9 = arith.constant 0 : i32
    %11 = arith.cmpi ne, %10, %c0_i32_9 : i32
    scf.if %11 {
      %c0_10 = arith.constant 0 : index
      %c0_11 = arith.constant 0 : index
      %12 = vector.load %arg5[%c0_10, %c0_11] : memref<8x128xf32, #tpu.memory_space<vmem>>, vector<8x128xf32>
      %c0_12 = arith.constant 0 : index
      %c0_13 = arith.constant 0 : index
      %13 = vector.load %arg4[%c0_12, %c0_13] : memref<8x128xf32, #tpu.memory_space<vmem>>, vector<8x128xf32>
      tpu.vector_store %arg4[%c0_12, %c0_13], %12 {strides = array<i32>} : memref<8x128xf32, #tpu.memory_space<vmem>>, vector<8x128xf32>,
    } else {
    }
    return
  }
  func.func @transform_0(%arg0: i32, %arg1: i32) -> (i32, i32) {
    %c0_i32 = arith.constant 0 : i32
    return %arg0, %arg1 : i32, i32
  }
  func.func @transform_1(%arg0: i32, %arg1: i32) -> (i32, i32) {
    %c0_i32 = arith.constant 0 : i32
    %c0_i32_0 = arith.constant 0 : i32
    return %arg1, %c0_i32 : i32, i32
  }
  func.func @transform_2(%arg0: i32, %arg1: i32) -> (i32, i32) {
    %c0_i32 = arith.constant 0 : i32
    %c0_i32_0 = arith.constant 0 : i32
    return %arg0, %c0_i32 : i32, i32
  }
}

module attributes {stable_mosaic.version = 11 : i64} {
  func.func @_matmul_kernel(%arg0: i32, %arg1: i32, %arg2: memref<8x1024xbf16, #tpu.memory_space<vmem>>, %arg3: memref<1024x128xbf16, #tpu.memory_space<vmem>>, %arg4: memref<8x128xf32, #tpu.memory_space<vmem>>, %arg5: memref<8x128xf32, #tpu.memory_space<vmem>>) attributes {dimension_semantics = [#tpu.dimension_semantics<parallel>, #tpu.dimension_semantics<arbitrary>], iteration_bounds = array<i64: 1, 1>, scalar_prefetch = 0 : i64, scratch_operands = 1 : i64, tpu.core_type = #tpu.core_type<tc>, window_params = [{transform_indices = @transform_0, window_bounds = array<i64: 8, 1024>}, {transform_indices = @transform_1, window_bounds = array<i64: 1024, 128>}, {transform_indices = @transform_2, window_bounds = array<i64: 8, 128>}]} {
    %c0_i32 = arith.constant 0 : i32
    %0 = arith.cmpi eq, %arg1, %c0_i32 : i32
    %1 = arith.extui %0 : i1 to i32
    %c0_i32_0 = arith.constant 0 : i32
    %2 = arith.cmpi ne, %1, %c0_i32_0 : i32
    scf.if %2 {
      %cst_10 = arith.constant 0.000000e+00 : f32
      %12 = vector.broadcast %cst_10 : f32 to vector<8x128xf32>
      %c0_11 = arith.constant 0 : index
      %c0_12 = arith.constant 0 : index
      %13 = vector.load %arg5[%c0_11, %c0_12] : memref<8x128xf32, #tpu.memory_space<vmem>>, vector<8x128xf32>
      tpu.vector_store %arg5[%c0_11, %c0_12], %12 {strides = array<i32>} : memref<8x128xf32, #tpu.memory_space<vmem>>, vector<8x128xf32>,
    } else {
    }
    %c0 = arith.constant 0 : index
    %c0_1 = arith.constant 0 : index
    %3 = vector.load %arg5[%c0, %c0_1] : memref<8x128xf32, #tpu.memory_space<vmem>>, vector<8x128xf32>
    %c0_2 = arith.constant 0 : index
    %c0_3 = arith.constant 0 : index
    %4 = vector.load %arg2[%c0_2, %c0_3] : memref<8x1024xbf16, #tpu.memory_space<vmem>>, vector<8x1024xbf16>
    %c0_4 = arith.constant 0 : index
    %c0_5 = arith.constant 0 : index
    %5 = vector.load %arg3[%c0_4, %c0_5] : memref<1024x128xbf16, #tpu.memory_space<vmem>>, vector<1024x128xbf16>
    %cst = arith.constant dense<0.000000e+00> : vector<8x128xf32>
    %6 = tpu.matmul %4, %5, %cst {dimension_numbers = #tpu.dot_dimension_numbers<[1], [0], [0], [1], [0, 0, 1, 1], [], []>} : vector<8x1024xbf16>, vector<1024x128xbf16>, vector<8x128xf32> -> vector<8x128xf32>
    %7 = arith.addf %3, %6 : vector<8x128xf32>
    %c0_6 = arith.constant 0 : index
    %c0_7 = arith.constant 0 : index
    %8 = vector.load %arg5[%c0_6, %c0_7] : memref<8x128xf32, #tpu.memory_space<vmem>>, vector<8x128xf32>
    tpu.vector_store %arg5[%c0_6, %c0_7], %7 {strides = array<i32>} : memref<8x128xf32, #tpu.memory_space<vmem>>, vector<8x128xf32>,
    %c0_i32_8 = arith.constant 0 : i32
    %9 = arith.cmpi eq, %arg1, %c0_i32_8 : i32
    %10 = arith.extui %9 : i1 to i32
    %c0_i32_9 = arith.constant 0 : i32
    %11 = arith.cmpi ne, %10, %c0_i32_9 : i32
    scf.if %11 {
      %c0_10 = arith.constant 0 : index
      %c0_11 = arith.constant 0 : index
      %12 = vector.load %arg5[%c0_10, %c0_11] : memref<8x128xf32, #tpu.memory_space<vmem>>, vector<8x128xf32>
      %c0_12 = arith.constant 0 : index
      %c0_13 = arith.constant 0 : index
      %13 = vector.load %arg4[%c0_12, %c0_13] : memref<8x128xf32, #tpu.memory_space<vmem>>, vector<8x128xf32>
      tpu.vector_store %arg4[%c0_12, %c0_13], %12 {strides = array<i32>} : memref<8x128xf32, #tpu.memory_space<vmem>>, vector<8x128xf32>,
    } else {
    }
    return
  }
  func.func @transform_0(%arg0: i32, %arg1: i32) -> (i32, i32) {
    %c0_i32 = arith.constant 0 : i32
    return %arg0, %arg1 : i32, i32
  }
  func.func @transform_1(%arg0: i32, %arg1: i32) -> (i32, i32) {
    %c0_i32 = arith.constant 0 : i32
    %c0_i32_0 = arith.constant 0 : i32
    return %arg1, %c0_i32 : i32, i32
  }
  func.func @transform_2(%arg0: i32, %arg1: i32) -> (i32, i32) {
    %c0_i32 = arith.constant 0 : i32
    %c0_i32_0 = arith.constant 0 : i32
    return %arg0, %c0_i32 : i32, i32
  }
}

</mosaic_0001>

<bundles_post_ra>
// kernel: a_call__.8
= control target key start
LH: loop header
LB: loop body
LE: loop exit
PB: predicated region body
PF: predicated region fallthrough
CT: control target
= control target key end

     0   :  { %s2102_s1 = inlined_call_operand.vmem [shape: bf16[128,128], index: 1, kind: input, shape index: {}]   ;;  %s2103_s0 = inlined_call_operand.vmem [shape: bf16[512,128], index: 0, kind: input, shape index: {}]   ;;  %s2104_s2 = inlined_call_operand.vmem [shape: bf16[512,128], index: 2, kind: output, shape index: {}]  }
   0x1   :  { %v1831_v0 = vld [vmem:[%s2102_s1] sm:$0xff]   ;;  %v1832_v1 = vld [vmem:[%s2102_s1 + $0x8] sm:$0xff]   ;;  %v1833_v2 = vld [vmem:[%s2102_s1 + $0x10] sm:$0xff]  }
   0x2   :  { %1735 = vmatprep.subr.bf16.mxu0 %v1831_v0  ;;  %1815 = vmatprep.subr.bf16.mxu1 %v1831_v0  ;;  %v1834_v3 = vld [vmem:[%s2102_s1 + $0x18] sm:$0xff]   ;;  %v1839_v4 = vld [vmem:[%s2103_s0] sm:$0xff]   ;;  %v1836_v7 = vld [vmem:[%s2102_s1 + $0x28] sm:$0xff]  }
   0x3   :  { %1736 = vmatpush3.bf16.msra.mxu0 %v1831_v0  ;;  %1823 = vmatpush3.bf16.msra.mxu1 %v1831_v0  ;;  %v1840_v5 = vld [vmem:[%s2103_s0 + $0x80] sm:$0xff]   ;;  %v1837_v8 = vld [vmem:[%s2102_s1 + $0x30] sm:$0xff]   ;;  %v1838_v9 = vld [vmem:[%s2102_s1 + $0x38] sm:$0xff]  }
   0x4   :  { %1737 = vmatprep.subr.bf16.mxu0 %v1832_v1  ;;  %1816 = vmatprep.subr.bf16.mxu1 %v1832_v1  ;;  %v1835_v6 = vld [vmem:[%s2102_s1 + $0x20] sm:$0xff]   ;;  %v1841_v10 = vld [vmem:[%s2103_s0 + $0x8] sm:$0xff]   ;;  %v1843_v12 = vld [vmem:[%s2103_s0 + $0x10] sm:$0xff]  }
   0x5   :  { %1751 = vmatprep.mubr.bf16.mxu0 %v1839_v4  ;;  %1783 = vmatprep.mubr.bf16.mxu1 %v1840_v5  ;;  %v1842_v11 = vld [vmem:[%s2103_s0 + $0x88] sm:$0xff]   ;;  %v1844_v13 = vld [vmem:[%s2103_s0 + $0x90] sm:$0xff]   ;;  %v1845_v14 = vld [vmem:[%s2103_s0 + $0x18] sm:$0xff]  }
   0x6   :  { %v1846_v15 = vld [vmem:[%s2103_s0 + $0x98] sm:$0xff]   ;;  %v1847_v16 = vld [vmem:[%s2103_s0 + $0x20] sm:$0xff]   ;;  %v1849_v18 = vld [vmem:[%s2103_s0 + $0x28] sm:$0xff]  }
   0x7   :  { %1738 = vmatpush3.bf16.msra.mxu0 %v1832_v1  ;;  %1824 = vmatpush3.bf16.msra.mxu1 %v1832_v1  ;;  %v1848_v17 = vld [vmem:[%s2103_s0 + $0xa0] sm:$0xff]   ;;  %v1850_v19 = vld [vmem:[%s2103_s0 + $0xa8] sm:$0xff]   ;;  %v1851_v20 = vld [vmem:[%s2103_s0 + $0x30] sm:$0xff]  }
   0x8   :  { %1739 = vmatprep.subr.bf16.mxu0 %v1833_v2  ;;  %1817 = vmatprep.subr.bf16.mxu1 %v1833_v2  ;;  %v1852_v21 = vld [vmem:[%s2103_s0 + $0xb0] sm:$0xff]   ;;  %v1853_v22 = vld [vmem:[%s2103_s0 + $0x38] sm:$0xff]   ;;  %v1855_v24 = vld [vmem:[%s2103_s0 + $0x40] sm:$0xff]  }
   0x9   :  { %v1854_v23 = vld [vmem:[%s2103_s0 + $0xb8] sm:$0xff]   ;;  %v1856_v25 = vld [vmem:[%s2103_s0 + $0xc0] sm:$0xff]   ;;  %v1857_v26 = vld [vmem:[%s2103_s0 + $0x48] sm:$0xff]  }
   0xa   :  { %v1858_v27 = vld [vmem:[%s2103_s0 + $0xc8] sm:$0xff]   ;;  %v1859_v28 = vld [vmem:[%s2103_s0 + $0x50] sm:$0xff]   ;;  %v1861_v30 = vld [vmem:[%s2103_s0 + $0x58] sm:$0xff]  }
   0xb   :  { %1740 = vmatpush3.bf16.msra.mxu0 %v1833_v2  ;;  %1825 = vmatpush3.bf16.msra.mxu1 %v1833_v2  ;;  %v1860_v29 = vld [vmem:[%s2103_s0 + $0xd0] sm:$0xff]   ;;  %v1862_v31 = vld [vmem:[%s2103_s0 + $0xd8] sm:$0xff]   ;;  %v1863_v32 = vld [vmem:[%s2103_s0 + $0x60] sm:$0xff]  }
   0xc   :  { %1741 = vmatprep.subr.bf16.mxu0 %v1834_v3  ;;  %1818 = vmatprep.subr.bf16.mxu1 %v1834_v3  ;;  %v1864_v33 = vld [vmem:[%s2103_s0 + $0xe0] sm:$0xff]   ;;  %v1865_v34 = vld [vmem:[%s2103_s0 + $0x68] sm:$0xff]   ;;  %v1867_v36 = vld [vmem:[%s2103_s0 + $0x70] sm:$0xff]  }
   0xd   :  { %v1866_v35 = vld [vmem:[%s2103_s0 + $0xe8] sm:$0xff]   ;;  %v1868_v37 = vld [vmem:[%s2103_s0 + $0xf0] sm:$0xff]   ;;  %v1869_v38 = vld [vmem:[%s2103_s0 + $0x78] sm:$0xff]  }
   0xe   :  { %v1870_v39 = vld [vmem:[%s2103_s0 + $0xf8] sm:$0xff]  }
   0xf   :  { %1742 = vmatpush3.bf16.msra.mxu0 %v1834_v3  ;;  %1826 = vmatpush3.bf16.msra.mxu1 %v1834_v3 }
  0x10   :  { %1743 = vmatprep.subr.bf16.mxu0 %v1835_v6  ;;  %1819 = vmatprep.subr.bf16.mxu1 %v1835_v6 }
  0x13   :  { %1744 = vmatpush3.bf16.msra.mxu0 %v1835_v6  ;;  %1827 = vmatpush3.bf16.msra.mxu1 %v1835_v6 }
  0x14   :  { %1745 = vmatprep.subr.bf16.mxu0 %v1836_v7  ;;  %1820 = vmatprep.subr.bf16.mxu1 %v1836_v7 }
  0x17   :  { %1746 = vmatpush3.bf16.msra.mxu0 %v1836_v7  ;;  %1828 = vmatpush3.bf16.msra.mxu1 %v1836_v7 }
  0x18   :  { %1747 = vmatprep.subr.bf16.mxu0 %v1837_v8  ;;  %1821 = vmatprep.subr.bf16.mxu1 %v1837_v8 }
  0x1b   :  { %1748 = vmatpush3.bf16.msra.mxu0 %v1837_v8  ;;  %1829 = vmatpush3.bf16.msra.mxu1 %v1837_v8 }
  0x1c   :  { %1749 = vmatprep.subr.bf16.mxu0 %v1838_v9  ;;  %1822 = vmatprep.subr.bf16.mxu1 %v1838_v9 }
  0x1f   :  { %1750 = vmatpush3.bf16.msra.mxu0 %v1838_v9  ;;  %1830 = vmatpush3.bf16.msra.mxu1 %v1838_v9 }
  0x22   :  { %1752 = vmatmul.mubr.bf16.vlgmr.msra.gmra.mrb[0].mxu0 %v1841_v10  ;;  %1784 = vmatmul.mubr.bf16.vlgmr.msra.gmra.mrb[0].mxu1 %v1842_v11 }
  0x23   :  { %1755 = vmatprep.mubr.bf16.mxu0 %v1843_v12  ;;  %1787 = vmatprep.mubr.bf16.mxu1 %v1844_v13 }
  0x2a   :  { %1756 = vmatmul.mubr.bf16.gmra.mrb[4].mxu0 %v1845_v14  ;;  %1788 = vmatmul.mubr.bf16.gmra.mrb[4].mxu1 %v1846_v15 }
  0x2b   :  { %1759 = vmatprep.mubr.bf16.mxu0 %v1847_v16  ;;  %1791 = vmatprep.mubr.bf16.mxu1 %v1848_v17 }
  0x32   :  { %1760 = vmatmul.mubr.bf16.gmra.mrb[8].mxu0 %v1849_v18  ;;  %1792 = vmatmul.mubr.bf16.gmra.mrb[8].mxu1 %v1850_v19 }
  0x33   :  { %1763 = vmatprep.mubr.bf16.mxu0 %v1851_v20  ;;  %1795 = vmatprep.mubr.bf16.mxu1 %v1852_v21 }
  0x3a   :  { %1764 = vmatmul.mubr.bf16.gmra.mrb[12].mxu0 %v1853_v22  ;;  %1796 = vmatmul.mubr.bf16.gmra.mrb[12].mxu1 %v1854_v23 }
  0x3b   :  { %1767 = vmatprep.mubr.bf16.mxu0 %v1855_v24  ;;  %1799 = vmatprep.mubr.bf16.mxu1 %v1856_v25 }
  0x42   :  { %1768 = vmatmul.mubr.bf16.gmra.mrb[16].mxu0 %v1857_v26  ;;  %1800 = vmatmul.mubr.bf16.gmra.mrb[16].mxu1 %v1858_v27 }
  0x43   :  { %1771 = vmatprep.mubr.bf16.mxu0 %v1859_v28  ;;  %1803 = vmatprep.mubr.bf16.mxu1 %v1860_v29 }
  0x4a   :  { %1772 = vmatmul.mubr.bf16.gmra.mrb[20].mxu0 %v1861_v30  ;;  %1804 = vmatmul.mubr.bf16.gmra.mrb[20].mxu1 %v1862_v31 }
  0x4b   :  { %1775 = vmatprep.mubr.bf16.mxu0 %v1863_v32  ;;  %1807 = vmatprep.mubr.bf16.mxu1 %v1864_v33 }
  0x52   :  { %1776 = vmatmul.mubr.bf16.gmra.mrb[24].mxu0 %v1865_v34  ;;  %1808 = vmatmul.mubr.bf16.gmra.mrb[24].mxu1 %v1866_v35 }
  0x53   :  { %1779 = vmatprep.mubr.bf16.mxu0 %v1867_v36  ;;  %1811 = vmatprep.mubr.bf16.mxu1 %v1868_v37 }
  0x5a   :  { %1780 = vmatmul.mubr.bf16.gmra.mrb[28].mxu0 %v1869_v38  ;;  %1812 = vmatmul.mubr.bf16.gmra.mrb[28].mxu1 %v1870_v39 }
  0xf5   :  { %v1753_v40 = vpop.f32.mrb[0].mxu0  ;;  %v1785_v41 = vpop.f32.mrb[0].mxu1 }
  0xf6   :  { %v498_v42 = vpop.f32.mrb[1].mxu0  ;;  %v626_v43 = vpop.f32.mrb[1].mxu1  ;;  %v950_v46 = vmax.f32 %v1753_v40, 0.0  ;;  %v982_v47 = vmax.f32 %v1785_v41, 0.0 }
  0xf7   :  { %v1754_v44 = vpop.f32.mrb[2].mxu0  ;;  %v1786_v45 = vpop.f32.mrb[2].mxu1  ;;  %v948_v52 = vmax.f32 %v498_v42, 0.0  ;;  %v980_v53 = vmax.f32 %v626_v43, 0.0 }
  0xf8   :  { %v951_v48 = vmax.f32 %v1754_v44, 0.0  ;;  %v983_v49 = vmax.f32 %v1786_v45, 0.0  ;;  %v501_v50 = vpop.f32.mrb[3].mxu0  ;;  %v629_v51 = vpop.f32.mrb[3].mxu1 }
  0xf9   :  { %v949_v54 = vmax.f32 %v501_v50, 0.0  ;;  %v981_v55 = vmax.f32 %v629_v51, 0.0 }
  0xfa   :  { %v1512_v56 = vpack.c.bf16 %v951_v48, %v950_v46  ;;  %v1592_v57 = vpack.c.bf16 %v983_v49, %v982_v47 }
  0xfb   :  { %v1507_v58 = vpack.c.bf16 %v949_v54, %v948_v52  ;;  %v1587_v59 = vpack.c.bf16 %v981_v55, %v980_v53 }
  0xfc   :  { %1664 = vst [vmem:[%s2104_s2 + $0x8] sm:$0xff] %v1512_v56   ;;  %1680 = vst [vmem:[%s2104_s2 + $0x88] sm:$0xff] %v1592_v57  }
  0xfd   :  { %1508 = vst [vmem:[%s2104_s2] sm:$0xff] %v1507_v58   ;;  %1679 = vst [vmem:[%s2104_s2 + $0x80] sm:$0xff] %v1587_v59   ;;  %v1757_v60 = vpop.f32.mrb[4].mxu0  ;;  %v1789_v61 = vpop.f32.mrb[4].mxu1 }
  0xfe   :  { %v514_v62 = vpop.f32.mrb[5].mxu0  ;;  %v642_v63 = vpop.f32.mrb[5].mxu1  ;;  %v954_v2 = vmax.f32 %v1757_v60, 0.0  ;;  %v986_v3 = vmax.f32 %v1789_v61, 0.0 }
  0xff   :  { %v1758_v0 = vpop.f32.mrb[6].mxu0  ;;  %v1790_v1 = vpop.f32.mrb[6].mxu1  ;;  %v952_v8 = vmax.f32 %v514_v62, 0.0  ;;  %v984_v9 = vmax.f32 %v642_v63, 0.0 }
 0x100   :  { %v955_v4 = vmax.f32 %v1758_v0, 0.0  ;;  %v987_v5 = vmax.f32 %v1790_v1, 0.0  ;;  %v517_v6 = vpop.f32.mrb[7].mxu0  ;;  %v645_v7 = vpop.f32.mrb[7].mxu1 }
 0x101   :  { %v953_v10 = vmax.f32 %v517_v6, 0.0  ;;  %v985_v11 = vmax.f32 %v645_v7, 0.0 }
 0x102   :  { %v1522_v12 = vpack.c.bf16 %v955_v4, %v954_v2  ;;  %v1602_v13 = vpack.c.bf16 %v987_v5, %v986_v3 }
 0x103   :  { %v1517_v14 = vpack.c.bf16 %v953_v10, %v952_v8  ;;  %v1597_v15 = vpack.c.bf16 %v985_v11, %v984_v9 }
 0x104   :  { %1666 = vst [vmem:[%s2104_s2 + $0x18] sm:$0xff] %v1522_v12   ;;  %1682 = vst [vmem:[%s2104_s2 + $0x98] sm:$0xff] %v1602_v13  }
 0x105   :  { %1665 = vst [vmem:[%s2104_s2 + $0x10] sm:$0xff] %v1517_v14   ;;  %1681 = vst [vmem:[%s2104_s2 + $0x90] sm:$0xff] %v1597_v15   ;;  %v1761_v16 = vpop.f32.mrb[8].mxu0  ;;  %v1793_v17 = vpop.f32.mrb[8].mxu1 }
 0x106   :  { %v530_v18 = vpop.f32.mrb[9].mxu0  ;;  %v658_v19 = vpop.f32.mrb[9].mxu1  ;;  %v958_v22 = vmax.f32 %v1761_v16, 0.0  ;;  %v990_v23 = vmax.f32 %v1793_v17, 0.0 }
 0x107   :  { %v1762_v20 = vpop.f32.mrb[10].mxu0  ;;  %v1794_v21 = vpop.f32.mrb[10].mxu1  ;;  %v956_v28 = vmax.f32 %v530_v18, 0.0  ;;  %v988_v29 = vmax.f32 %v658_v19, 0.0 }
 0x108   :  { %v959_v24 = vmax.f32 %v1762_v20, 0.0  ;;  %v991_v25 = vmax.f32 %v1794_v21, 0.0  ;;  %v533_v26 = vpop.f32.mrb[11].mxu0  ;;  %v661_v27 = vpop.f32.mrb[11].mxu1 }
 0x109   :  { %v957_v30 = vmax.f32 %v533_v26, 0.0  ;;  %v989_v31 = vmax.f32 %v661_v27, 0.0 }
 0x10a   :  { %v1532_v32 = vpack.c.bf16 %v959_v24, %v958_v22  ;;  %v1612_v33 = vpack.c.bf16 %v991_v25, %v990_v23 }
 0x10b   :  { %v1527_v34 = vpack.c.bf16 %v957_v30, %v956_v28  ;;  %v1607_v35 = vpack.c.bf16 %v989_v31, %v988_v29 }
 0x10c   :  { %1668 = vst [vmem:[%s2104_s2 + $0x28] sm:$0xff] %v1532_v32   ;;  %1684 = vst [vmem:[%s2104_s2 + $0xa8] sm:$0xff] %v1612_v33  }
 0x10d   :  { %1667 = vst [vmem:[%s2104_s2 + $0x20] sm:$0xff] %v1527_v34   ;;  %1683 = vst [vmem:[%s2104_s2 + $0xa0] sm:$0xff] %v1607_v35   ;;  %v1765_v36 = vpop.f32.mrb[12].mxu0  ;;  %v1797_v37 = vpop.f32.mrb[12].mxu1 }
 0x10e   :  { %v546_v38 = vpop.f32.mrb[13].mxu0  ;;  %v674_v39 = vpop.f32.mrb[13].mxu1  ;;  %v962_v42 = vmax.f32 %v1765_v36, 0.0  ;;  %v994_v43 = vmax.f32 %v1797_v37, 0.0 }
 0x10f   :  { %v1766_v40 = vpop.f32.mrb[14].mxu0  ;;  %v1798_v41 = vpop.f32.mrb[14].mxu1  ;;  %v960_v48 = vmax.f32 %v546_v38, 0.0  ;;  %v992_v49 = vmax.f32 %v674_v39, 0.0 }
 0x110   :  { %v963_v44 = vmax.f32 %v1766_v40, 0.0  ;;  %v995_v45 = vmax.f32 %v1798_v41, 0.0  ;;  %v549_v46 = vpop.f32.mrb[15].mxu0  ;;  %v677_v47 = vpop.f32.mrb[15].mxu1 }
 0x111   :  { %v961_v50 = vmax.f32 %v549_v46, 0.0  ;;  %v993_v51 = vmax.f32 %v677_v47, 0.0 }
 0x112   :  { %v1542_v52 = vpack.c.bf16 %v963_v44, %v962_v42  ;;  %v1622_v53 = vpack.c.bf16 %v995_v45, %v994_v43 }
 0x113   :  { %v1537_v54 = vpack.c.bf16 %v961_v50, %v960_v48  ;;  %v1617_v55 = vpack.c.bf16 %v993_v51, %v992_v49 }
 0x114   :  { %1670 = vst [vmem:[%s2104_s2 + $0x38] sm:$0xff] %v1542_v52   ;;  %1686 = vst [vmem:[%s2104_s2 + $0xb8] sm:$0xff] %v1622_v53  }
 0x115   :  { %1669 = vst [vmem:[%s2104_s2 + $0x30] sm:$0xff] %v1537_v54   ;;  %1685 = vst [vmem:[%s2104_s2 + $0xb0] sm:$0xff] %v1617_v55   ;;  %v1769_v56 = vpop.f32.mrb[16].mxu0  ;;  %v1801_v57 = vpop.f32.mrb[16].mxu1 }
 0x116   :  { %v562_v58 = vpop.f32.mrb[17].mxu0  ;;  %v690_v59 = vpop.f32.mrb[17].mxu1  ;;  %v966_v62 = vmax.f32 %v1769_v56, 0.0  ;;  %v998_v63 = vmax.f32 %v1801_v57, 0.0 }
 0x117   :  { %v1770_v60 = vpop.f32.mrb[18].mxu0  ;;  %v1802_v61 = vpop.f32.mrb[18].mxu1  ;;  %v964_v4 = vmax.f32 %v562_v58, 0.0  ;;  %v996_v5 = vmax.f32 %v690_v59, 0.0 }
 0x118   :  { %v967_v0 = vmax.f32 %v1770_v60, 0.0  ;;  %v999_v1 = vmax.f32 %v1802_v61, 0.0  ;;  %v565_v2 = vpop.f32.mrb[19].mxu0  ;;  %v693_v3 = vpop.f32.mrb[19].mxu1 }
 0x119   :  { %v965_v6 = vmax.f32 %v565_v2, 0.0  ;;  %v997_v7 = vmax.f32 %v693_v3, 0.0 }
 0x11a   :  { %v1552_v8 = vpack.c.bf16 %v967_v0, %v966_v62  ;;  %v1632_v9 = vpack.c.bf16 %v999_v1, %v998_v63 }
 0x11b   :  { %v1547_v10 = vpack.c.bf16 %v965_v6, %v964_v4  ;;  %v1627_v11 = vpack.c.bf16 %v997_v7, %v996_v5 }
 0x11c   :  { %1672 = vst [vmem:[%s2104_s2 + $0x48] sm:$0xff] %v1552_v8   ;;  %1688 = vst [vmem:[%s2104_s2 + $0xc8] sm:$0xff] %v1632_v9  }
 0x11d   :  { %1671 = vst [vmem:[%s2104_s2 + $0x40] sm:$0xff] %v1547_v10   ;;  %1687 = vst [vmem:[%s2104_s2 + $0xc0] sm:$0xff] %v1627_v11   ;;  %v1773_v12 = vpop.f32.mrb[20].mxu0  ;;  %v1805_v13 = vpop.f32.mrb[20].mxu1 }
 0x11e   :  { %v578_v14 = vpop.f32.mrb[21].mxu0  ;;  %v706_v15 = vpop.f32.mrb[21].mxu1  ;;  %v970_v18 = vmax.f32 %v1773_v12, 0.0  ;;  %v1002_v19 = vmax.f32 %v1805_v13, 0.0 }
 0x11f   :  { %v1774_v16 = vpop.f32.mrb[22].mxu0  ;;  %v1806_v17 = vpop.f32.mrb[22].mxu1  ;;  %v968_v24 = vmax.f32 %v578_v14, 0.0  ;;  %v1000_v25 = vmax.f32 %v706_v15, 0.0 }
 0x120   :  { %v971_v20 = vmax.f32 %v1774_v16, 0.0  ;;  %v1003_v21 = vmax.f32 %v1806_v17, 0.0  ;;  %v581_v22 = vpop.f32.mrb[23].mxu0  ;;  %v709_v23 = vpop.f32.mrb[23].mxu1 }
 0x121   :  { %v969_v26 = vmax.f32 %v581_v22, 0.0  ;;  %v1001_v27 = vmax.f32 %v709_v23, 0.0 }
 0x122   :  { %v1562_v28 = vpack.c.bf16 %v971_v20, %v970_v18  ;;  %v1642_v29 = vpack.c.bf16 %v1003_v21, %v1002_v19 }
 0x123   :  { %v1557_v30 = vpack.c.bf16 %v969_v26, %v968_v24  ;;  %v1637_v31 = vpack.c.bf16 %v1001_v27, %v1000_v25 }
 0x124   :  { %1674 = vst [vmem:[%s2104_s2 + $0x58] sm:$0xff] %v1562_v28   ;;  %1690 = vst [vmem:[%s2104_s2 + $0xd8] sm:$0xff] %v1642_v29  }
 0x125   :  { %1673 = vst [vmem:[%s2104_s2 + $0x50] sm:$0xff] %v1557_v30   ;;  %1689 = vst [vmem:[%s2104_s2 + $0xd0] sm:$0xff] %v1637_v31   ;;  %v1777_v32 = vpop.f32.mrb[24].mxu0  ;;  %v1809_v33 = vpop.f32.mrb[24].mxu1 }
 0x126   :  { %v594_v34 = vpop.f32.mrb[25].mxu0  ;;  %v722_v35 = vpop.f32.mrb[25].mxu1  ;;  %v974_v38 = vmax.f32 %v1777_v32, 0.0  ;;  %v1006_v39 = vmax.f32 %v1809_v33, 0.0 }
 0x127   :  { %v1778_v36 = vpop.f32.mrb[26].mxu0  ;;  %v1810_v37 = vpop.f32.mrb[26].mxu1  ;;  %v972_v44 = vmax.f32 %v594_v34, 0.0  ;;  %v1004_v45 = vmax.f32 %v722_v35, 0.0 }
 0x128   :  { %v975_v40 = vmax.f32 %v1778_v36, 0.0  ;;  %v1007_v41 = vmax.f32 %v1810_v37, 0.0  ;;  %v597_v42 = vpop.f32.mrb[27].mxu0  ;;  %v725_v43 = vpop.f32.mrb[27].mxu1 }
 0x129   :  { %v973_v46 = vmax.f32 %v597_v42, 0.0  ;;  %v1005_v47 = vmax.f32 %v725_v43, 0.0 }
 0x12a   :  { %v1572_v48 = vpack.c.bf16 %v975_v40, %v974_v38  ;;  %v1652_v49 = vpack.c.bf16 %v1007_v41, %v1006_v39 }
 0x12b   :  { %v1567_v50 = vpack.c.bf16 %v973_v46, %v972_v44  ;;  %v1647_v51 = vpack.c.bf16 %v1005_v47, %v1004_v45 }
 0x12c   :  { %1676 = vst [vmem:[%s2104_s2 + $0x68] sm:$0xff] %v1572_v48   ;;  %1692 = vst [vmem:[%s2104_s2 + $0xe8] sm:$0xff] %v1652_v49  }
 0x12d   :  { %1675 = vst [vmem:[%s2104_s2 + $0x60] sm:$0xff] %v1567_v50   ;;  %1691 = vst [vmem:[%s2104_s2 + $0xe0] sm:$0xff] %v1647_v51   ;;  %v1781_v52 = vpop.f32.mrb[28].mxu0  ;;  %v1813_v53 = vpop.f32.mrb[28].mxu1 }
 0x12e   :  { %v610_v54 = vpop.f32.mrb[29].mxu0  ;;  %v738_v55 = vpop.f32.mrb[29].mxu1  ;;  %v978_v58 = vmax.f32 %v1781_v52, 0.0  ;;  %v1010_v59 = vmax.f32 %v1813_v53, 0.0 }
 0x12f   :  { %v1782_v56 = vpop.f32.mrb[30].mxu0  ;;  %v1814_v57 = vpop.f32.mrb[30].mxu1  ;;  %v976_v0 = vmax.f32 %v610_v54, 0.0  ;;  %v1008_v1 = vmax.f32 %v738_v55, 0.0 }
 0x130   :  { %v979_v60 = vmax.f32 %v1782_v56, 0.0  ;;  %v1011_v61 = vmax.f32 %v1814_v57, 0.0  ;;  %v613_v62 = vpop.f32.mrb[31].mxu0  ;;  %v741_v63 = vpop.f32.mrb[31].mxu1 }
 0x131   :  { %v977_v2 = vmax.f32 %v613_v62, 0.0  ;;  %v1009_v3 = vmax.f32 %v741_v63, 0.0 }
 0x132   :  { %v1582_v4 = vpack.c.bf16 %v979_v60, %v978_v58  ;;  %v1662_v5 = vpack.c.bf16 %v1011_v61, %v1010_v59 }
 0x133   :  { %v1577_v6 = vpack.c.bf16 %v977_v2, %v976_v0  ;;  %v1657_v7 = vpack.c.bf16 %v1009_v3, %v1008_v1 }
 0x134   :  { %1678 = vst [vmem:[%s2104_s2 + $0x78] sm:$0xff] %v1582_v4   ;;  %1694 = vst [vmem:[%s2104_s2 + $0xf8] sm:$0xff] %v1662_v5  }
 0x135   :  { %1677 = vst [vmem:[%s2104_s2 + $0x70] sm:$0xff] %v1577_v6   ;;  %1693 = vst [vmem:[%s2104_s2 + $0xf0] sm:$0xff] %v1657_v7  }

// kernel: a_call__.9
= control target key start
LH: loop header
LB: loop body
LE: loop exit
PB: predicated region body
PF: predicated region fallthrough
CT: control target
= control target key end

     0   :  { %s551_s1 = inlined_call_operand.vmem [shape: bf16[128,128], index: 1, kind: input, shape index: {}]   ;;  %s552_s0 = inlined_call_operand.vmem [shape: bf16[128,128], index: 0, kind: input, shape index: {}]   ;;  %s553_s2 = inlined_call_operand.vmem [shape: f32[128,128], index: 2, kind: output, shape index: {}]  }
   0x1   :  { %v424_v0 = vld [vmem:[%s551_s1] sm:$0xff]   ;;  %v425_v1 = vld [vmem:[%s551_s1 + $0x8] sm:$0xff]   ;;  %v426_v2 = vld [vmem:[%s551_s1 + $0x10] sm:$0xff]  }
   0x2   :  { %376 = vmatprep.subr.bf16.mxu0 %v424_v0  ;;  %408 = vmatprep.subr.bf16.mxu1 %v424_v0  ;;  %v427_v3 = vld [vmem:[%s551_s1 + $0x18] sm:$0xff]   ;;  %v432_v4 = vld [vmem:[%s552_s0] sm:$0xff]   ;;  %v429_v7 = vld [vmem:[%s551_s1 + $0x28] sm:$0xff]  }
   0x3   :  { %377 = vmatpush3.bf16.msra.mxu0 %v424_v0  ;;  %416 = vmatpush3.bf16.msra.mxu1 %v424_v0  ;;  %v433_v5 = vld [vmem:[%s552_s0 + $0x20] sm:$0xff]   ;;  %v430_v8 = vld [vmem:[%s551_s1 + $0x30] sm:$0xff]   ;;  %v431_v9 = vld [vmem:[%s551_s1 + $0x38] sm:$0xff]  }
   0x4   :  { %378 = vmatprep.subr.bf16.mxu0 %v425_v1  ;;  %409 = vmatprep.subr.bf16.mxu1 %v425_v1  ;;  %v428_v6 = vld [vmem:[%s551_s1 + $0x20] sm:$0xff]   ;;  %v434_v10 = vld [vmem:[%s552_s0 + $0x8] sm:$0xff]   ;;  %v436_v12 = vld [vmem:[%s552_s0 + $0x10] sm:$0xff]  }
   0x5   :  { %392 = vmatprep.mubr.bf16.mxu0 %v432_v4  ;;  %400 = vmatprep.mubr.bf16.mxu1 %v433_v5  ;;  %v435_v11 = vld [vmem:[%s552_s0 + $0x28] sm:$0xff]   ;;  %v437_v13 = vld [vmem:[%s552_s0 + $0x30] sm:$0xff]   ;;  %v438_v14 = vld [vmem:[%s552_s0 + $0x18] sm:$0xff]  }
   0x6   :  { %v439_v15 = vld [vmem:[%s552_s0 + $0x38] sm:$0xff]  }
   0x7   :  { %379 = vmatpush3.bf16.msra.mxu0 %v425_v1  ;;  %417 = vmatpush3.bf16.msra.mxu1 %v425_v1 }
   0x8   :  { %380 = vmatprep.subr.bf16.mxu0 %v426_v2  ;;  %410 = vmatprep.subr.bf16.mxu1 %v426_v2 }
   0xb   :  { %381 = vmatpush3.bf16.msra.mxu0 %v426_v2  ;;  %418 = vmatpush3.bf16.msra.mxu1 %v426_v2 }
   0xc   :  { %382 = vmatprep.subr.bf16.mxu0 %v427_v3  ;;  %411 = vmatprep.subr.bf16.mxu1 %v427_v3 }
   0xf   :  { %383 = vmatpush3.bf16.msra.mxu0 %v427_v3  ;;  %419 = vmatpush3.bf16.msra.mxu1 %v427_v3 }
  0x10   :  { %384 = vmatprep.subr.bf16.mxu0 %v428_v6  ;;  %412 = vmatprep.subr.bf16.mxu1 %v428_v6 }
  0x13   :  { %385 = vmatpush3.bf16.msra.mxu0 %v428_v6  ;;  %420 = vmatpush3.bf16.msra.mxu1 %v428_v6 }
  0x14   :  { %386 = vmatprep.subr.bf16.mxu0 %v429_v7  ;;  %413 = vmatprep.subr.bf16.mxu1 %v429_v7 }
  0x17   :  { %387 = vmatpush3.bf16.msra.mxu0 %v429_v7  ;;  %421 = vmatpush3.bf16.msra.mxu1 %v429_v7 }
  0x18   :  { %388 = vmatprep.subr.bf16.mxu0 %v430_v8  ;;  %414 = vmatprep.subr.bf16.mxu1 %v430_v8 }
  0x1b   :  { %389 = vmatpush3.bf16.msra.mxu0 %v430_v8  ;;  %422 = vmatpush3.bf16.msra.mxu1 %v430_v8 }
  0x1c   :  { %390 = vmatprep.subr.bf16.mxu0 %v431_v9  ;;  %415 = vmatprep.subr.bf16.mxu1 %v431_v9 }
  0x1f   :  { %391 = vmatpush3.bf16.msra.mxu0 %v431_v9  ;;  %423 = vmatpush3.bf16.msra.mxu1 %v431_v9 }
  0x22   :  { %393 = vmatmul.mubr.bf16.vlgmr.msra.gmra.mrb[0].mxu0 %v434_v10  ;;  %401 = vmatmul.mubr.bf16.vlgmr.msra.gmra.mrb[0].mxu1 %v435_v11 }
  0x23   :  { %396 = vmatprep.mubr.bf16.mxu0 %v436_v12  ;;  %404 = vmatprep.mubr.bf16.mxu1 %v437_v13 }
  0x2a   :  { %397 = vmatmul.mubr.bf16.gmra.mrb[4].mxu0 %v438_v14  ;;  %405 = vmatmul.mubr.bf16.gmra.mrb[4].mxu1 %v439_v15 }
  0xf5   :  { %v394_v16 = vpop.f32.mrb[0].mxu0  ;;  %v402_v17 = vpop.f32.mrb[0].mxu1 }
  0xf6   :  { %326 = vst [vmem:[%s553_s2 + $0x10] sm:$0xff] %v394_v16  ;;  %334 = vst [vmem:[%s553_s2 + $0x50] sm:$0xff] %v402_v17  ;;  %v210_v18 = vpop.f32.mrb[1].mxu0  ;;  %v242_v19 = vpop.f32.mrb[1].mxu1 }
  0xf7   :  { %324 = vst [vmem:[%s553_s2] sm:$0xff] %v210_v18  ;;  %332 = vst [vmem:[%s553_s2 + $0x40] sm:$0xff] %v242_v19  ;;  %v395_v20 = vpop.f32.mrb[2].mxu0  ;;  %v403_v21 = vpop.f32.mrb[2].mxu1 }
  0xf8   :  { %327 = vst [vmem:[%s553_s2 + $0x18] sm:$0xff] %v395_v20  ;;  %335 = vst [vmem:[%s553_s2 + $0x58] sm:$0xff] %v403_v21  ;;  %v213_v22 = vpop.f32.mrb[3].mxu0  ;;  %v245_v23 = vpop.f32.mrb[3].mxu1 }
  0xf9   :  { %325 = vst [vmem:[%s553_s2 + $0x8] sm:$0xff] %v213_v22  ;;  %333 = vst [vmem:[%s553_s2 + $0x48] sm:$0xff] %v245_v23 }
  0xfd   :  { %v398_v24 = vpop.f32.mrb[4].mxu0  ;;  %v406_v25 = vpop.f32.mrb[4].mxu1 }
  0xfe   :  { %330 = vst [vmem:[%s553_s2 + $0x30] sm:$0xff] %v398_v24  ;;  %338 = vst [vmem:[%s553_s2 + $0x70] sm:$0xff] %v406_v25  ;;  %v226_v26 = vpop.f32.mrb[5].mxu0  ;;  %v258_v27 = vpop.f32.mrb[5].mxu1 }
  0xff   :  { %328 = vst [vmem:[%s553_s2 + $0x20] sm:$0xff] %v226_v26  ;;  %336 = vst [vmem:[%s553_s2 + $0x60] sm:$0xff] %v258_v27  ;;  %v399_v28 = vpop.f32.mrb[6].mxu0  ;;  %v407_v29 = vpop.f32.mrb[6].mxu1 }
 0x100   :  { %331 = vst [vmem:[%s553_s2 + $0x38] sm:$0xff] %v399_v28  ;;  %339 = vst [vmem:[%s553_s2 + $0x78] sm:$0xff] %v407_v29  ;;  %v229_v30 = vpop.f32.mrb[7].mxu0  ;;  %v261_v31 = vpop.f32.mrb[7].mxu1 }
 0x101   :  { %329 = vst [vmem:[%s553_s2 + $0x28] sm:$0xff] %v229_v30  ;;  %337 = vst [vmem:[%s553_s2 + $0x68] sm:$0xff] %v261_v31 }

// kernel: a_call__.10
= control target key start
LH: loop header
LB: loop body
LE: loop exit
PB: predicated region body
PF: predicated region fallthrough
CT: control target
= control target key end

     0   :  { %s391_s0 = inlined_call_operand.vmem [shape: f32[128,128], index: 0, kind: input, shape index: {}]   ;;  %s392_s1 = inlined_call_operand.vmem [shape: f32[1,128], index: 1, kind: input, shape index: {}]   ;;  %s393_s2 = inlined_call_operand.vmem [shape: f32[1,128], index: 2, kind: input, shape index: {}]   ;;  %s394_s3 = inlined_call_operand.vmem [shape: bf16[128,128], index: 3, kind: output, shape index: {}]  }
   0x1   :  { %v14_v0 = vld [vmem:[%s391_s0] sm:$0xff]  ;;  %v15_v1 = vld [vmem:[%s391_s0 + $0x8] sm:$0xff]  ;;  %v16_v6 = vld [vmem:[%s391_s0 + $0x10] sm:$0xff] }
   0x2   :  { %v286_v2 = vld [vmem:[%s392_s1] ss:$0 sm:$0xff]  ;;  %v17_v7 = vld [vmem:[%s391_s0 + $0x18] sm:$0xff]  ;;  %v19_v11 = vld [vmem:[%s391_s0 + $0x28] sm:$0xff] }
   0x3   :  { %v37_v3 = vmul.f32 %v286_v2, %v14_v0  ;;  %v38_v4 = vmul.f32 %v286_v2, %v15_v1  ;;  %v293_v5 = vld [vmem:[%s393_s2] ss:$0 sm:$0xff]  ;;  %v39_v8 = vmul.f32 %v286_v2, %v16_v6  ;;  %v40_v9 = vmul.f32 %v286_v2, %v17_v7  ;;  %v20_v12 = vld [vmem:[%s391_s0 + $0x30] sm:$0xff]  ;;  %v21_v17 = vld [vmem:[%s391_s0 + $0x38] sm:$0xff] }
   0x4   :  { %v18_v10 = vld [vmem:[%s391_s0 + $0x20] sm:$0xff]  ;;  %v42_v16 = vmul.f32 %v286_v2, %v19_v11  ;;  %v43_v20 = vmul.f32 %v286_v2, %v20_v12  ;;  %v44_v21 = vmul.f32 %v286_v2, %v21_v17  ;;  %v23_v27 = vld [vmem:[%s391_s0 + $0x48] sm:$0xff]  ;;  %v24_v32 = vld [vmem:[%s391_s0 + $0x50] sm:$0xff] }
   0x5   :  { %v60_v13 = vadd.f32 %v293_v5, %v37_v3  ;;  %v61_v14 = vadd.f32 %v293_v5, %v38_v4  ;;  %v41_v15 = vmul.f32 %v286_v2, %v18_v10  ;;  %v62_v18 = vadd.f32 %v293_v5, %v39_v8  ;;  %v22_v22 = vld [vmem:[%s391_s0 + $0x40] sm:$0xff]  ;;  %v25_v33 = vld [vmem:[%s391_s0 + $0x58] sm:$0xff]  ;;  %v27_v39 = vld [vmem:[%s391_s0 + $0x68] sm:$0xff] }
   0x6   :  { %v63_v19 = vadd.f32 %v293_v5, %v40_v9  ;;  %v65_v26 = vadd.f32 %v293_v5, %v42_v16  ;;  %v66_v30 = vadd.f32 %v293_v5, %v43_v20  ;;  %v67_v31 = vadd.f32 %v293_v5, %v44_v21  ;;  %v26_v38 = vld [vmem:[%s391_s0 + $0x60] sm:$0xff]  ;;  %v28_v44 = vld [vmem:[%s391_s0 + $0x70] sm:$0xff]  ;;  %v29_v49 = vld [vmem:[%s391_s0 + $0x78] sm:$0xff] }
   0x7   :  { %v76_v23 = vmax.f32 %v60_v13, 0.0  ;;  %v77_v24 = vmax.f32 %v61_v14, 0.0  ;;  %v64_v25 = vadd.f32 %v293_v5, %v41_v15  ;;  %v78_v28 = vmax.f32 %v62_v18, 0.0 }
   0x8   :  { %v79_v29 = vmax.f32 %v63_v19, 0.0  ;;  %v81_v36 = vmax.f32 %v65_v26, 0.0  ;;  %v45_v37 = vmul.f32 %v286_v2, %v22_v22  ;;  %v82_v41 = vmax.f32 %v66_v30, 0.0 }
   0x9   :  { %v213_v34 = vpack.c.bf16 %v77_v24, %v76_v23  ;;  %v80_v35 = vmax.f32 %v64_v25, 0.0  ;;  %v83_v42 = vmax.f32 %v67_v31, 0.0  ;;  %v46_v43 = vmul.f32 %v286_v2, %v23_v27 }
   0xa   :  { %v218_v40 = vpack.c.bf16 %v79_v29, %v78_v28  ;;  %v68_v46 = vadd.f32 %v293_v5, %v45_v37  ;;  %v47_v47 = vmul.f32 %v286_v2, %v24_v32  ;;  %v48_v48 = vmul.f32 %v286_v2, %v25_v33 }
   0xb   :  { %214 = vst [vmem:[%s394_s3] sm:$0xff] %v213_v34   ;;  %v223_v45 = vpack.c.bf16 %v81_v36, %v80_v35  ;;  %v228_v50 = vpack.c.bf16 %v83_v42, %v82_v41  ;;  %v69_v51 = vadd.f32 %v293_v5, %v46_v43  ;;  %v49_v52 = vmul.f32 %v286_v2, %v26_v38 }
   0xc   :  { %250 = vst [vmem:[%s394_s3 + $0x8] sm:$0xff] %v218_v40   ;;  %v50_v53 = vmul.f32 %v286_v2, %v27_v39  ;;  %v84_v54 = vmax.f32 %v68_v46, 0.0  ;;  %v70_v55 = vadd.f32 %v293_v5, %v47_v47  ;;  %v71_v56 = vadd.f32 %v293_v5, %v48_v48 }
   0xd   :  { %251 = vst [vmem:[%s394_s3 + $0x10] sm:$0xff] %v223_v45   ;;  %v51_v57 = vmul.f32 %v286_v2, %v28_v44  ;;  %252 = vst [vmem:[%s394_s3 + $0x18] sm:$0xff] %v228_v50   ;;  %v85_v58 = vmax.f32 %v69_v51, 0.0  ;;  %v72_v59 = vadd.f32 %v293_v5, %v49_v52  ;;  %v52_v61 = vmul.f32 %v286_v2, %v29_v49 }
   0xe   :  { %v73_v60 = vadd.f32 %v293_v5, %v50_v53  ;;  %v86_v62 = vmax.f32 %v70_v55, 0.0  ;;  %v87_v63 = vmax.f32 %v71_v56, 0.0 }
   0xf   :  { %v74_v0 = vadd.f32 %v293_v5, %v51_v57  ;;  %v233_v1 = vpack.c.bf16 %v85_v58, %v84_v54  ;;  %v88_v3 = vmax.f32 %v72_v59, 0.0  ;;  %v75_v6 = vadd.f32 %v293_v5, %v52_v61 }
  0x10   :  { %v89_v4 = vmax.f32 %v73_v60, 0.0  ;;  %v238_v7 = vpack.c.bf16 %v87_v63, %v86_v62 }
  0x11   :  { %v90_v8 = vmax.f32 %v74_v0, 0.0  ;;  %253 = vst [vmem:[%s394_s3 + $0x20] sm:$0xff] %v233_v1   ;;  %v91_v10 = vmax.f32 %v75_v6, 0.0 }
  0x12   :  { %v243_v9 = vpack.c.bf16 %v89_v4, %v88_v3  ;;  %254 = vst [vmem:[%s394_s3 + $0x28] sm:$0xff] %v238_v7  }
  0x13   :  { %v248_v2 = vpack.c.bf16 %v91_v10, %v90_v8 }
  0x14   :  { %255 = vst [vmem:[%s394_s3 + $0x30] sm:$0xff] %v243_v9  }
  0x15   :  { %256 = vst [vmem:[%s394_s3 + $0x38] sm:$0xff] %v248_v2  }

// kernel: a_call__.11
= control target key start
LH: loop header
LB: loop body
LE: loop exit
PB: predicated region body
PF: predicated region fallthrough
CT: control target
= control target key end

     0   :  { %s421_s1 = inlined_call_operand.vmem [shape: bf16[256,128], index: 1, kind: input, shape index: {}]   ;;  %s422_s0 = inlined_call_operand.vmem [shape: bf16[32,256], index: 0, kind: input, shape index: {}]   ;;  %s423_s2 = inlined_call_operand.vmem [shape: f32[32,128], index: 2, kind: output, shape index: {}]  }
   0x1   :  { %v312_v0 = vld [vmem:[%s421_s1 + $0x40] sm:$0xff]   ;;  %v314_v2 = vld [vmem:[%s421_s1 + $0x48] sm:$0xff]   ;;  %v316_v4 = vld [vmem:[%s421_s1 + $0x50] sm:$0xff]  }
   0x2   :  { %v313_v1 = vld [vmem:[%s421_s1] sm:$0xff]   ;;  %268 = vmatprep.subr.bf16.mxu0 %v312_v0  ;;  %296 = vmatprep.subr.bf16.mxu1 %v312_v0  ;;  %v315_v3 = vld [vmem:[%s421_s1 + $0x8] sm:$0xff]   ;;  %v317_v5 = vld [vmem:[%s421_s1 + $0x10] sm:$0xff]  }
   0x3   :  { %269 = vmatpush3.bf16.msra.mxu0 %v313_v1  ;;  %304 = vmatpush3.bf16.msra.mxu1 %v313_v1  ;;  %v318_v6 = vld [vmem:[%s421_s1 + $0x58] sm:$0xff]   ;;  %v320_v8 = vld [vmem:[%s421_s1 + $0x60] sm:$0xff]   ;;  %v322_v10 = vld [vmem:[%s421_s1 + $0x68] sm:$0xff]  }
   0x4   :  { %270 = vmatprep.subr.bf16.mxu0 %v314_v2  ;;  %297 = vmatprep.subr.bf16.mxu1 %v314_v2  ;;  %v319_v7 = vld [vmem:[%s421_s1 + $0x18] sm:$0xff]   ;;  %v321_v9 = vld [vmem:[%s421_s1 + $0x20] sm:$0xff]   ;;  %v323_v13 = vld [vmem:[%s421_s1 + $0x28] sm:$0xff]  }
   0x5   :  { %v330_v11 = vld [vmem:[%s422_s0 + $0x4] ss:$8 sps:$4 sm:$0xff]   ;;  %v333_v12 = vld [vmem:[%s422_s0 + $0x14] ss:$8 sps:$4 sm:$0xff]   ;;  %v328_v18 = vld [vmem:[%s422_s0] ss:$8 sps:$4 sm:$0xff]  }
   0x6   :  { %v324_v14 = vld [vmem:[%s421_s1 + $0x70] sm:$0xff]   ;;  %208 = vmatprep.mubr.bf16.mxu0 %v330_v11  ;;  %216 = vmatprep.mubr.bf16.mxu1 %v333_v12  ;;  %v326_v16 = vld [vmem:[%s421_s1 + $0x78] sm:$0xff]  }
   0x7   :  { %271 = vmatpush3.bf16.msra.mxu0 %v315_v3  ;;  %305 = vmatpush3.bf16.msra.mxu1 %v315_v3  ;;  %v325_v15 = vld [vmem:[%s421_s1 + $0x30] sm:$0xff]   ;;  %v327_v17 = vld [vmem:[%s421_s1 + $0x38] sm:$0xff]  }
   0x8   :  { %272 = vmatprep.subr.bf16.mxu0 %v316_v4  ;;  %298 = vmatprep.subr.bf16.mxu1 %v316_v4  ;;  %v331_v19 = vld [vmem:[%s422_s0 + $0x10] ss:$8 sps:$4 sm:$0xff]  }
   0xb   :  { %273 = vmatpush3.bf16.msra.mxu0 %v317_v5  ;;  %306 = vmatpush3.bf16.msra.mxu1 %v317_v5 }
   0xc   :  { %274 = vmatprep.subr.bf16.mxu0 %v318_v6  ;;  %299 = vmatprep.subr.bf16.mxu1 %v318_v6 }
   0xf   :  { %275 = vmatpush3.bf16.msra.mxu0 %v319_v7  ;;  %307 = vmatpush3.bf16.msra.mxu1 %v319_v7 }
  0x10   :  { %276 = vmatprep.subr.bf16.mxu0 %v320_v8  ;;  %300 = vmatprep.subr.bf16.mxu1 %v320_v8 }
  0x13   :  { %277 = vmatpush3.bf16.msra.mxu0 %v321_v9  ;;  %308 = vmatpush3.bf16.msra.mxu1 %v321_v9 }
  0x14   :  { %278 = vmatprep.subr.bf16.mxu0 %v322_v10  ;;  %301 = vmatprep.subr.bf16.mxu1 %v322_v10 }
  0x17   :  { %279 = vmatpush3.bf16.msra.mxu0 %v323_v13  ;;  %309 = vmatpush3.bf16.msra.mxu1 %v323_v13 }
  0x18   :  { %280 = vmatprep.subr.bf16.mxu0 %v324_v14  ;;  %302 = vmatprep.subr.bf16.mxu1 %v324_v14 }
  0x1b   :  { %281 = vmatpush3.bf16.msra.mxu0 %v325_v15  ;;  %310 = vmatpush3.bf16.msra.mxu1 %v325_v15 }
  0x1c   :  { %282 = vmatprep.subr.bf16.mxu0 %v326_v16  ;;  %303 = vmatprep.subr.bf16.mxu1 %v326_v16 }
  0x1f   :  { %283 = vmatpush3.bf16.msra.mxu0 %v327_v17  ;;  %311 = vmatpush3.bf16.msra.mxu1 %v327_v17 }
  0x22   :  { %209 = vmatmul.mubr.bf16.vlgmr.msra.gmra.mrb[0].mxu0 %v328_v18  ;;  %217 = vmatmul.mubr.bf16.vlgmr.msra.gmra.mrb[0].mxu1 %v331_v19 }
  0xf5   :  { %v284_v20 = vpop.f32.mrb[0].mxu0  ;;  %v290_v21 = vpop.f32.mrb[0].mxu1 }
  0xf6   :  { %v285_v22 = vpop.f32.mrb[1].mxu0  ;;  %v291_v23 = vpop.f32.mrb[1].mxu1 }
  0xf7   :  { %v286_v24 = vadd.f32 %v285_v22, %v284_v20  ;;  %v292_v25 = vadd.f32 %v291_v23, %v290_v21  ;;  %v287_v26 = vpop.f32.mrb[2].mxu0  ;;  %v293_v27 = vpop.f32.mrb[2].mxu1 }
  0xf8   :  { %v288_v28 = vpop.f32.mrb[3].mxu0  ;;  %v294_v29 = vpop.f32.mrb[3].mxu1 }
  0xf9   :  { %240 = vst [vmem:[%s423_s2] sm:$0xff] %v286_v24  ;;  %242 = vst [vmem:[%s423_s2 + $0x10] sm:$0xff] %v292_v25  ;;  %v289_v30 = vadd.f32 %v288_v28, %v287_v26  ;;  %v295_v31 = vadd.f32 %v294_v29, %v293_v27 }
  0xfb   :  { %241 = vst [vmem:[%s423_s2 + $0x8] sm:$0xff] %v289_v30  ;;  %243 = vst [vmem:[%s423_s2 + $0x18] sm:$0xff] %v295_v31 }

// kernel: a_call__.12
= control target key start
LH: loop header
LB: loop body
LE: loop exit
PB: predicated region body
PF: predicated region fallthrough
CT: control target
= control target key end

     0   :  { %s133_s0 = inlined_call_operand.vmem [shape: f32[32,128], index: 0, kind: input, shape index: {}]   ;;  %s134_s1 = inlined_call_operand.vmem [shape: f32[1,128], index: 1, kind: input, shape index: {}]   ;;  %s135_s2 = inlined_call_operand.vmem [shape: f32[1,128], index: 2, kind: input, shape index: {}]   ;;  %s136_s3 = inlined_call_operand.vmem [shape: bf16[32,128], index: 3, kind: output, shape index: {}]  }
   0x1   :  { %v14_v0 = vld [vmem:[%s133_s0] sm:$0xff]  ;;  %v15_v1 = vld [vmem:[%s133_s0 + $0x8] sm:$0xff]  ;;  %v16_v6 = vld [vmem:[%s133_s0 + $0x10] sm:$0xff] }
   0x2   :  { %v68_v2 = vld [vmem:[%s134_s1] ss:$0 sm:$0xff]  ;;  %v17_v7 = vld [vmem:[%s133_s0 + $0x18] sm:$0xff] }
   0x3   :  { %v25_v3 = vmul.f32 %v68_v2, %v14_v0  ;;  %v26_v4 = vmul.f32 %v68_v2, %v15_v1  ;;  %v69_v5 = vld [vmem:[%s135_s2] ss:$0 sm:$0xff]  ;;  %v27_v8 = vmul.f32 %v68_v2, %v16_v6  ;;  %v28_v9 = vmul.f32 %v68_v2, %v17_v7 }
   0x5   :  { %v36_v10 = vadd.f32 %v69_v5, %v25_v3  ;;  %v37_v11 = vadd.f32 %v69_v5, %v26_v4  ;;  %v38_v12 = vadd.f32 %v69_v5, %v27_v8  ;;  %v39_v13 = vadd.f32 %v69_v5, %v28_v9 }
   0x7   :  { %v40_v14 = vmax.f32 %v36_v10, 0.0  ;;  %v41_v15 = vmax.f32 %v37_v11, 0.0  ;;  %v42_v16 = vmax.f32 %v38_v12, 0.0  ;;  %v43_v17 = vmax.f32 %v39_v13, 0.0 }
   0x9   :  { %v81_v18 = vpack.c.bf16 %v41_v15, %v40_v14  ;;  %v86_v19 = vpack.c.bf16 %v43_v17, %v42_v16 }
   0xb   :  { %82 = vst [vmem:[%s136_s3] sm:$0xff] %v81_v18   ;;  %88 = vst [vmem:[%s136_s3 + $0x8] sm:$0xff] %v86_v19  }

// kernel: a_call__.14
= control target key start
LH: loop header
LB: loop body
LE: loop exit
PB: predicated region body
PF: predicated region fallthrough
CT: control target
= control target key end

     0   :  { %s72_s0 = inlined_call_operand.vmem [shape: f32[8,128], index: 0, kind: input, shape index: {}]   ;;  %s73_s1 = inlined_call_operand.vmem [shape: f32[1,128], index: 1, kind: input, shape index: {}]   ;;  %s74_s2 = inlined_call_operand.vmem [shape: f32[1,128], index: 2, kind: input, shape index: {}]   ;;  %s75_s3 = inlined_call_operand.vmem [shape: bf16[8,128], index: 3, kind: output, shape index: {}]  }
   0x1   :  { %v14_v0 = vld [vmem:[%s72_s0] sm:$0xff] }
   0x2   :  { %v38_v1 = vld [vmem:[%s73_s1] ss:$0 sm:$0xff] }
   0x3   :  { %v39_v2 = vld [vmem:[%s74_s2] ss:$0 sm:$0xff]  ;;  %v22_v3 = vmul.f32 %v38_v1, %v14_v0 }
   0x5   :  { %v30_v4 = vadd.f32 %v39_v2, %v22_v3 }
   0x7   :  { %v31_v5 = vmax.f32 %v30_v4, 0.0 }
   0x9   :  { %v32_v6 = vpack.c.bf16 %v31_v5, %v31_v5 }
   0xb   :  { %33 = vst [vmem:[%s75_s3] sm:$0xf] %v32_v6 }

// kernel: a_call__.13
= control target key start
LH: loop header
LB: loop body
LE: loop exit
PB: predicated region body
PF: predicated region fallthrough
CT: control target
= control target key end

     0   :  { %s617_s1 = inlined_call_operand.vmem [shape: bf16[512,128], index: 1, kind: input, shape index: {}]   ;;  %s618_s0 = inlined_call_operand.vmem [shape: bf16[8,512], index: 0, kind: input, shape index: {}]   ;;  %s619_s2 = inlined_call_operand.vmem [shape: f32[8,128], index: 2, kind: output, shape index: {}]  }
   0x1   :  { %v461_v0 = vld [vmem:[%s617_s1 + $0x40] sm:$0xff]   ;;  %v465_v4 = vld [vmem:[%s617_s1 + $0x48] sm:$0xff]   ;;  %v469_v8 = vld [vmem:[%s617_s1 + $0x50] sm:$0xff]  }
   0x2   :  { %v462_v1 = vld [vmem:[%s617_s1 + $0xc0] sm:$0xff]   ;;  %417 = vmatprep.subr.bf16.mxu0 %v461_v0  ;;  %v466_v5 = vld [vmem:[%s617_s1 + $0xc8] sm:$0xff]   ;;  %v470_v9 = vld [vmem:[%s617_s1 + $0xd0] sm:$0xff]  }
   0x3   :  { %v463_v2 = vld [vmem:[%s617_s1] sm:$0xff]   ;;  %439 = vmatprep.subr.bf16.mxu1 %v462_v1  ;;  %v467_v6 = vld [vmem:[%s617_s1 + $0x8] sm:$0xff]   ;;  %v471_v10 = vld [vmem:[%s617_s1 + $0x10] sm:$0xff]  }
   0x4   :  { %v464_v3 = vld [vmem:[%s617_s1 + $0x80] sm:$0xff]   ;;  %418 = vmatpush3.bf16.msra.mxu0 %v463_v2  ;;  %v468_v7 = vld [vmem:[%s617_s1 + $0x88] sm:$0xff]   ;;  %v472_v11 = vld [vmem:[%s617_s1 + $0x90] sm:$0xff]  }
   0x5   :  { %440 = vmatpush3.bf16.msra.mxu1 %v464_v3  ;;  %419 = vmatprep.subr.bf16.mxu0 %v465_v4  ;;  %v473_v12 = vld [vmem:[%s617_s1 + $0x58] sm:$0xff]   ;;  %v477_v16 = vld [vmem:[%s617_s1 + $0x60] sm:$0xff]   ;;  %v481_v20 = vld [vmem:[%s617_s1 + $0x68] sm:$0xff]  }
   0x6   :  { %441 = vmatprep.subr.bf16.mxu1 %v466_v5  ;;  %v474_v13 = vld [vmem:[%s617_s1 + $0xd8] sm:$0xff]   ;;  %v478_v17 = vld [vmem:[%s617_s1 + $0xe0] sm:$0xff]   ;;  %v482_v21 = vld [vmem:[%s617_s1 + $0xe8] sm:$0xff]  }
   0x7   :  { %v475_v14 = vld [vmem:[%s617_s1 + $0x18] sm:$0xff]   ;;  %v479_v18 = vld [vmem:[%s617_s1 + $0x20] sm:$0xff]   ;;  %v483_v22 = vld [vmem:[%s617_s1 + $0x28] sm:$0xff]  }
   0x8   :  { %420 = vmatpush3.bf16.msra.mxu0 %v467_v6  ;;  %v476_v15 = vld [vmem:[%s617_s1 + $0x98] sm:$0xff]   ;;  %v480_v19 = vld [vmem:[%s617_s1 + $0xa0] sm:$0xff]   ;;  %v484_v23 = vld [vmem:[%s617_s1 + $0xa8] sm:$0xff]  }
   0x9   :  { %442 = vmatpush3.bf16.msra.mxu1 %v468_v7  ;;  %421 = vmatprep.subr.bf16.mxu0 %v469_v8  ;;  %v485_v24 = vld [vmem:[%s617_s1 + $0x70] sm:$0xff]   ;;  %v489_v28 = vld [vmem:[%s617_s1 + $0x78] sm:$0xff]   ;;  %v18_v32 = vld [vmem:[%s618_s0] sm:$0xff] }
   0xa   :  { %443 = vmatprep.subr.bf16.mxu1 %v470_v9  ;;  %v486_v25 = vld [vmem:[%s617_s1 + $0xf0] sm:$0xff]   ;;  %v490_v29 = vld [vmem:[%s617_s1 + $0xf8] sm:$0xff]   ;;  %v19_v33 = vld [vmem:[%s618_s0 + $0x8] sm:$0xff]  ;;  %v381_v34 = vcombine.low %v18_v32, %v18_v32  ;;  %v382_v35 = vcombine.high %v18_v32, %v18_v32 }
   0xb   :  { %v487_v26 = vld [vmem:[%s617_s1 + $0x30] sm:$0xff]   ;;  %v491_v30 = vld [vmem:[%s617_s1 + $0x38] sm:$0xff]   ;;  %v383_v36 = vcombine.low %v19_v33, %v19_v33  ;;  %v384_v37 = vcombine.high %v19_v33, %v19_v33 }
   0xc   :  { %422 = vmatpush3.bf16.msra.mxu0 %v471_v10  ;;  %v488_v27 = vld [vmem:[%s617_s1 + $0xb0] sm:$0xff]   ;;  %v492_v31 = vld [vmem:[%s617_s1 + $0xb8] sm:$0xff]   ;;  %322 = vmatprep.mubr.bf16.mxu0 %v382_v35 }
   0xd   :  { %444 = vmatpush3.bf16.msra.mxu1 %v472_v11  ;;  %423 = vmatprep.subr.bf16.mxu0 %v473_v12 }
   0xe   :  { %445 = vmatprep.subr.bf16.mxu1 %v474_v13  ;;  %362 = vmatprep.mubr.bf16.mxu1 %v384_v37 }
  0x10   :  { %424 = vmatpush3.bf16.msra.mxu0 %v475_v14 }
  0x11   :  { %446 = vmatpush3.bf16.msra.mxu1 %v476_v15  ;;  %425 = vmatprep.subr.bf16.mxu0 %v477_v16 }
  0x12   :  { %447 = vmatprep.subr.bf16.mxu1 %v478_v17 }
  0x14   :  { %426 = vmatpush3.bf16.msra.mxu0 %v479_v18 }
  0x15   :  { %448 = vmatpush3.bf16.msra.mxu1 %v480_v19  ;;  %427 = vmatprep.subr.bf16.mxu0 %v481_v20 }
  0x16   :  { %449 = vmatprep.subr.bf16.mxu1 %v482_v21 }
  0x18   :  { %428 = vmatpush3.bf16.msra.mxu0 %v483_v22 }
  0x19   :  { %450 = vmatpush3.bf16.msra.mxu1 %v484_v23  ;;  %429 = vmatprep.subr.bf16.mxu0 %v485_v24 }
  0x1a   :  { %451 = vmatprep.subr.bf16.mxu1 %v486_v25 }
  0x1c   :  { %430 = vmatpush3.bf16.msra.mxu0 %v487_v26 }
  0x1d   :  { %452 = vmatpush3.bf16.msra.mxu1 %v488_v27  ;;  %431 = vmatprep.subr.bf16.mxu0 %v489_v28 }
  0x1e   :  { %453 = vmatprep.subr.bf16.mxu1 %v490_v29 }
  0x20   :  { %432 = vmatpush3.bf16.msra.mxu0 %v491_v30 }
  0x21   :  { %454 = vmatpush3.bf16.msra.mxu1 %v492_v31 }
  0x23   :  { %323 = vmatmul.mubr.bf16.vlgmr.msra.gmra.mrb[0].mxu0 %v381_v34 }
  0x24   :  { %363 = vmatmul.mubr.bf16.vlgmr.msra.gmra.mrb[0].mxu1 %v383_v36 }
  0xf6   :  { %v433_v38 = vpop.f32.mrb[0].mxu0 }
  0xf7   :  { %v455_v39 = vpop.f32.mrb[0].mxu1  ;;  %v434_v40 = vpop.f32.mrb[1].mxu0 }
  0xf8   :  { %v456_v41 = vpop.f32.mrb[1].mxu1  ;;  %v435_v42 = vadd.f32 %v434_v40, %v433_v38  ;;  %v436_v44 = vpop.f32.mrb[2].mxu0 }
  0xf9   :  { %v457_v43 = vadd.f32 %v456_v41, %v455_v39  ;;  %v458_v45 = vpop.f32.mrb[2].mxu1  ;;  %v437_v46 = vpop.f32.mrb[3].mxu0 }
  0xfa   :  { %v459_v47 = vpop.f32.mrb[3].mxu1 }
  0xfb   :  { %v365_v48 = vadd.f32 %v457_v43, %v435_v42 }
  0xfd   :  { %376 = vst [vmem:[%s619_s2] sm:$0xff] %v365_v48 }

// kernel: a_call__.15
= control target key start
LH: loop header
LB: loop body
LE: loop exit
PB: predicated region body
PF: predicated region fallthrough
CT: control target
= control target key end

     0   :  { %s1187_s1 = inlined_call_operand.vmem [shape: bf16[1024,128], index: 1, kind: input, shape index: {}]   ;;  %s1188_s0 = inlined_call_operand.vmem [shape: bf16[8,1024], index: 0, kind: input, shape index: {}]   ;;  %s1189_s2 = inlined_call_operand.vmem [shape: f32[8,128], index: 2, kind: output, shape index: {}]  }
   0x1   :  { %v893_v0 = vld [vmem:[%s1187_s1 + $0x40] sm:$0xff]   ;;  %v897_v4 = vld [vmem:[%s1187_s1 + $0x48] sm:$0xff]   ;;  %v901_v8 = vld [vmem:[%s1187_s1 + $0x50] sm:$0xff]  }
   0x2   :  { %v894_v1 = vld [vmem:[%s1187_s1 + $0xc0] sm:$0xff]   ;;  %805 = vmatprep.subr.bf16.mxu0 %v893_v0  ;;  %v898_v5 = vld [vmem:[%s1187_s1 + $0xc8] sm:$0xff]   ;;  %v902_v9 = vld [vmem:[%s1187_s1 + $0xd0] sm:$0xff]  }
   0x3   :  { %v895_v2 = vld [vmem:[%s1187_s1] sm:$0xff]   ;;  %827 = vmatprep.subr.bf16.mxu1 %v894_v1  ;;  %v899_v6 = vld [vmem:[%s1187_s1 + $0x8] sm:$0xff]   ;;  %v903_v10 = vld [vmem:[%s1187_s1 + $0x10] sm:$0xff]  }
   0x4   :  { %v896_v3 = vld [vmem:[%s1187_s1 + $0x80] sm:$0xff]   ;;  %806 = vmatpush3.bf16.msra.mxu0 %v895_v2  ;;  %v900_v7 = vld [vmem:[%s1187_s1 + $0x88] sm:$0xff]   ;;  %v904_v11 = vld [vmem:[%s1187_s1 + $0x90] sm:$0xff]  }
   0x5   :  { %828 = vmatpush3.bf16.msra.mxu1 %v896_v3  ;;  %807 = vmatprep.subr.bf16.mxu0 %v897_v4  ;;  %v905_v12 = vld [vmem:[%s1187_s1 + $0x58] sm:$0xff]   ;;  %v909_v16 = vld [vmem:[%s1187_s1 + $0x60] sm:$0xff]   ;;  %v913_v20 = vld [vmem:[%s1187_s1 + $0x68] sm:$0xff]  }
   0x6   :  { %829 = vmatprep.subr.bf16.mxu1 %v898_v5  ;;  %v906_v13 = vld [vmem:[%s1187_s1 + $0xd8] sm:$0xff]   ;;  %v910_v17 = vld [vmem:[%s1187_s1 + $0xe0] sm:$0xff]   ;;  %v914_v21 = vld [vmem:[%s1187_s1 + $0xe8] sm:$0xff]  }
   0x7   :  { %v907_v14 = vld [vmem:[%s1187_s1 + $0x18] sm:$0xff]   ;;  %v911_v18 = vld [vmem:[%s1187_s1 + $0x20] sm:$0xff]   ;;  %v915_v22 = vld [vmem:[%s1187_s1 + $0x28] sm:$0xff]  }
   0x8   :  { %808 = vmatpush3.bf16.msra.mxu0 %v899_v6  ;;  %v908_v15 = vld [vmem:[%s1187_s1 + $0x98] sm:$0xff]   ;;  %v912_v19 = vld [vmem:[%s1187_s1 + $0xa0] sm:$0xff]   ;;  %v916_v23 = vld [vmem:[%s1187_s1 + $0xa8] sm:$0xff]  }
   0x9   :  { %830 = vmatpush3.bf16.msra.mxu1 %v900_v7  ;;  %809 = vmatprep.subr.bf16.mxu0 %v901_v8  ;;  %v917_v24 = vld [vmem:[%s1187_s1 + $0x70] sm:$0xff]   ;;  %v921_v28 = vld [vmem:[%s1187_s1 + $0x78] sm:$0xff]   ;;  %v18_v32 = vld [vmem:[%s1188_s0] sm:$0xff] }
   0xa   :  { %831 = vmatprep.subr.bf16.mxu1 %v902_v9  ;;  %v918_v25 = vld [vmem:[%s1187_s1 + $0xf0] sm:$0xff]   ;;  %v922_v29 = vld [vmem:[%s1187_s1 + $0xf8] sm:$0xff]   ;;  %v19_v33 = vld [vmem:[%s1188_s0 + $0x8] sm:$0xff]  ;;  %v733_v34 = vcombine.low %v18_v32, %v18_v32  ;;  %v734_v35 = vcombine.high %v18_v32, %v18_v32 }
   0xb   :  { %v919_v26 = vld [vmem:[%s1187_s1 + $0x30] sm:$0xff]   ;;  %v923_v30 = vld [vmem:[%s1187_s1 + $0x38] sm:$0xff]   ;;  %v735_v36 = vcombine.low %v19_v33, %v19_v33  ;;  %v736_v37 = vcombine.high %v19_v33, %v19_v33  ;;  %v929_v38 = vld [vmem:[%s1187_s1 + $0x140] sm:$0xff]  }
   0xc   :  { %810 = vmatpush3.bf16.msra.mxu0 %v903_v10  ;;  %v920_v27 = vld [vmem:[%s1187_s1 + $0xb0] sm:$0xff]   ;;  %v924_v31 = vld [vmem:[%s1187_s1 + $0xb8] sm:$0xff]   ;;  %v930_v39 = vld [vmem:[%s1187_s1 + $0x1c0] sm:$0xff]   ;;  %594 = vmatprep.mubr.bf16.mxu0 %v734_v35 }
   0xd   :  { %832 = vmatpush3.bf16.msra.mxu1 %v904_v11  ;;  %811 = vmatprep.subr.bf16.mxu0 %v905_v12  ;;  %v931_v40 = vld [vmem:[%s1187_s1 + $0x100] sm:$0xff]   ;;  %v933_v42 = vld [vmem:[%s1187_s1 + $0x148] sm:$0xff]   ;;  %v937_v46 = vld [vmem:[%s1187_s1 + $0x150] sm:$0xff]  }
   0xe   :  { %833 = vmatprep.subr.bf16.mxu1 %v906_v13  ;;  %634 = vmatprep.mubr.bf16.mxu1 %v736_v37  ;;  %v932_v41 = vld [vmem:[%s1187_s1 + $0x180] sm:$0xff]   ;;  %v934_v43 = vld [vmem:[%s1187_s1 + $0x1c8] sm:$0xff]   ;;  %v938_v47 = vld [vmem:[%s1187_s1 + $0x1d0] sm:$0xff]  }
   0xf   :  { %v935_v44 = vld [vmem:[%s1187_s1 + $0x108] sm:$0xff]   ;;  %v939_v48 = vld [vmem:[%s1187_s1 + $0x110] sm:$0xff]   ;;  %v941_v50 = vld [vmem:[%s1187_s1 + $0x158] sm:$0xff]  }
  0x10   :  { %812 = vmatpush3.bf16.msra.mxu0 %v907_v14  ;;  %v936_v45 = vld [vmem:[%s1187_s1 + $0x188] sm:$0xff]   ;;  %v940_v49 = vld [vmem:[%s1187_s1 + $0x190] sm:$0xff]   ;;  %v942_v51 = vld [vmem:[%s1187_s1 + $0x1d8] sm:$0xff]  }
  0x11   :  { %834 = vmatpush3.bf16.msra.mxu1 %v908_v15  ;;  %813 = vmatprep.subr.bf16.mxu0 %v909_v16  ;;  %v943_v52 = vld [vmem:[%s1187_s1 + $0x118] sm:$0xff]   ;;  %v945_v54 = vld [vmem:[%s1187_s1 + $0x160] sm:$0xff]   ;;  %v949_v58 = vld [vmem:[%s1187_s1 + $0x168] sm:$0xff]  }
  0x12   :  { %835 = vmatprep.subr.bf16.mxu1 %v910_v17  ;;  %v944_v53 = vld [vmem:[%s1187_s1 + $0x198] sm:$0xff]   ;;  %v946_v55 = vld [vmem:[%s1187_s1 + $0x1e0] sm:$0xff]   ;;  %v950_v59 = vld [vmem:[%s1187_s1 + $0x1e8] sm:$0xff]  }
  0x13   :  { %v947_v56 = vld [vmem:[%s1187_s1 + $0x120] sm:$0xff]   ;;  %v951_v60 = vld [vmem:[%s1187_s1 + $0x128] sm:$0xff]   ;;  %v953_v62 = vld [vmem:[%s1187_s1 + $0x170] sm:$0xff]  }
  0x14   :  { %814 = vmatpush3.bf16.msra.mxu0 %v911_v18  ;;  %v948_v57 = vld [vmem:[%s1187_s1 + $0x1a0] sm:$0xff]   ;;  %v952_v61 = vld [vmem:[%s1187_s1 + $0x1a8] sm:$0xff]   ;;  %v954_v63 = vld [vmem:[%s1187_s1 + $0x1f0] sm:$0xff]  }
  0x15   :  { %836 = vmatpush3.bf16.msra.mxu1 %v912_v19  ;;  %815 = vmatprep.subr.bf16.mxu0 %v913_v20  ;;  %v955_v0 = vld [vmem:[%s1187_s1 + $0x130] sm:$0xff]   ;;  %v957_v2 = vld [vmem:[%s1187_s1 + $0x178] sm:$0xff]  }
  0x16   :  { %837 = vmatprep.subr.bf16.mxu1 %v914_v21  ;;  %v956_v1 = vld [vmem:[%s1187_s1 + $0x1b0] sm:$0xff]   ;;  %v958_v3 = vld [vmem:[%s1187_s1 + $0x1f8] sm:$0xff]  }
  0x17   :  { %v959_v4 = vld [vmem:[%s1187_s1 + $0x138] sm:$0xff]   ;;  %v20_v6 = vld [vmem:[%s1188_s0 + $0x10] sm:$0xff] }
  0x18   :  { %816 = vmatpush3.bf16.msra.mxu0 %v915_v22  ;;  %v960_v5 = vld [vmem:[%s1187_s1 + $0x1b8] sm:$0xff]   ;;  %v737_v7 = vcombine.low %v20_v6, %v20_v6  ;;  %v738_v8 = vcombine.high %v20_v6, %v20_v6 }
  0x19   :  { %838 = vmatpush3.bf16.msra.mxu1 %v916_v23  ;;  %817 = vmatprep.subr.bf16.mxu0 %v917_v24  ;;  %v21_v9 = vld [vmem:[%s1188_s0 + $0x18] sm:$0xff] }
  0x1a   :  { %839 = vmatprep.subr.bf16.mxu1 %v918_v25  ;;  %v739_v10 = vcombine.low %v21_v9, %v21_v9  ;;  %v740_v11 = vcombine.high %v21_v9, %v21_v9 }
  0x1c   :  { %818 = vmatpush3.bf16.msra.mxu0 %v919_v26 }
  0x1d   :  { %840 = vmatpush3.bf16.msra.mxu1 %v920_v27  ;;  %819 = vmatprep.subr.bf16.mxu0 %v921_v28 }
  0x1e   :  { %841 = vmatprep.subr.bf16.mxu1 %v922_v29 }
  0x20   :  { %820 = vmatpush3.bf16.msra.mxu0 %v923_v30 }
  0x21   :  { %842 = vmatpush3.bf16.msra.mxu1 %v924_v31  ;;  %849 = vmatprep.subr.bf16.mxu0 %v929_v38 }
  0x22   :  { %871 = vmatprep.subr.bf16.mxu1 %v930_v39 }
  0x23   :  { %595 = vmatmul.mubr.bf16.vlgmr.msra.gmra.mrb[0].mxu0 %v733_v34 }
  0x24   :  { %635 = vmatmul.mubr.bf16.vlgmr.msra.gmra.mrb[0].mxu1 %v735_v36  ;;  %850 = vmatpush3.bf16.msra.mxu0 %v931_v40 }
  0x25   :  { %872 = vmatpush3.bf16.msra.mxu1 %v932_v41  ;;  %851 = vmatprep.subr.bf16.mxu0 %v933_v42 }
  0x26   :  { %873 = vmatprep.subr.bf16.mxu1 %v934_v43  ;;  %674 = vmatprep.mubr.bf16.mxu0 %v738_v8 }
  0x27   :  { %714 = vmatprep.mubr.bf16.mxu1 %v740_v11 }
  0x28   :  { %852 = vmatpush3.bf16.msra.mxu0 %v935_v44 }
  0x29   :  { %874 = vmatpush3.bf16.msra.mxu1 %v936_v45  ;;  %853 = vmatprep.subr.bf16.mxu0 %v937_v46 }
  0x2a   :  { %875 = vmatprep.subr.bf16.mxu1 %v938_v47 }
  0x2c   :  { %854 = vmatpush3.bf16.msra.mxu0 %v939_v48 }
  0x2d   :  { %876 = vmatpush3.bf16.msra.mxu1 %v940_v49  ;;  %855 = vmatprep.subr.bf16.mxu0 %v941_v50 }
  0x2e   :  { %877 = vmatprep.subr.bf16.mxu1 %v942_v51 }
  0x30   :  { %856 = vmatpush3.bf16.msra.mxu0 %v943_v52 }
  0x31   :  { %878 = vmatpush3.bf16.msra.mxu1 %v944_v53  ;;  %857 = vmatprep.subr.bf16.mxu0 %v945_v54 }
  0x32   :  { %879 = vmatprep.subr.bf16.mxu1 %v946_v55 }
  0x34   :  { %858 = vmatpush3.bf16.msra.mxu0 %v947_v56 }
  0x35   :  { %880 = vmatpush3.bf16.msra.mxu1 %v948_v57  ;;  %859 = vmatprep.subr.bf16.mxu0 %v949_v58 }
  0x36   :  { %881 = vmatprep.subr.bf16.mxu1 %v950_v59 }
  0x38   :  { %860 = vmatpush3.bf16.msra.mxu0 %v951_v60 }
  0x39   :  { %882 = vmatpush3.bf16.msra.mxu1 %v952_v61  ;;  %861 = vmatprep.subr.bf16.mxu0 %v953_v62 }
  0x3a   :  { %883 = vmatprep.subr.bf16.mxu1 %v954_v63 }
  0x3c   :  { %862 = vmatpush3.bf16.msra.mxu0 %v955_v0 }
  0x3d   :  { %884 = vmatpush3.bf16.msra.mxu1 %v956_v1  ;;  %863 = vmatprep.subr.bf16.mxu0 %v957_v2 }
  0x3e   :  { %885 = vmatprep.subr.bf16.mxu1 %v958_v3 }
  0x40   :  { %864 = vmatpush3.bf16.msra.mxu0 %v959_v4 }
  0x41   :  { %886 = vmatpush3.bf16.msra.mxu1 %v960_v5 }
  0x43   :  { %675 = vmatmul.mubr.bf16.vlgmr.msra.gmra.mrb[4].mxu0 %v737_v7 }
  0x44   :  { %715 = vmatmul.mubr.bf16.vlgmr.msra.gmra.mrb[4].mxu1 %v739_v10 }
  0xf6   :  { %v821_v12 = vpop.f32.mrb[0].mxu0 }
  0xf7   :  { %v843_v13 = vpop.f32.mrb[0].mxu1  ;;  %v822_v14 = vpop.f32.mrb[1].mxu0 }
  0xf8   :  { %v844_v15 = vpop.f32.mrb[1].mxu1  ;;  %v823_v16 = vadd.f32 %v822_v14, %v821_v12  ;;  %v824_v18 = vpop.f32.mrb[2].mxu0 }
  0xf9   :  { %v845_v17 = vadd.f32 %v844_v15, %v843_v13  ;;  %v846_v19 = vpop.f32.mrb[2].mxu1  ;;  %v825_v20 = vpop.f32.mrb[3].mxu0 }
  0xfa   :  { %v847_v21 = vpop.f32.mrb[3].mxu1 }
  0xfb   :  { %v637_v22 = vadd.f32 %v845_v17, %v823_v16 }
 0x116   :  { %v865_v23 = vpop.f32.mrb[4].mxu0 }
 0x117   :  { %v887_v24 = vpop.f32.mrb[4].mxu1  ;;  %v866_v25 = vpop.f32.mrb[5].mxu0 }
 0x118   :  { %v888_v26 = vpop.f32.mrb[5].mxu1  ;;  %v867_v27 = vadd.f32 %v866_v25, %v865_v23  ;;  %v868_v29 = vpop.f32.mrb[6].mxu0 }
 0x119   :  { %v889_v28 = vadd.f32 %v888_v26, %v887_v24  ;;  %v890_v30 = vpop.f32.mrb[6].mxu1  ;;  %v869_v31 = vpop.f32.mrb[7].mxu0 }
 0x11a   :  { %v891_v32 = vpop.f32.mrb[7].mxu1  ;;  %v677_v33 = vadd.f32 %v867_v27, %v637_v22 }
 0x11c   :  { %v717_v34 = vadd.f32 %v889_v28, %v677_v33 }
 0x11e   :  { %728 = vst [vmem:[%s1189_s2] sm:$0xff] %v717_v34 }

</bundles_post_ra>
